<compile_context>
chip_gen: v5e
topology: v5e:2x2
jax: 0.10.0
libtpu: 0.0.40
codegen_flags: <defaults>
</compile_context>

<pallas_src>
import math

import numpy as np
import jax
import jax.numpy as jnp
from jax.experimental import pallas as pl
from jax.experimental.pallas import tpu as pltpu

# ----------------------------- model hyperparams -----------------------------
NTOKEN  = 32      # vocab size (small, synthetic)
NINP    = 16      # d_model (divisible by nhead)
NHEAD   = 2
NHID    = 32      # feed-forward hidden size (small stand-in for nhid=200)
NLAYERS = 2
HEAD_DIM = NINP // NHEAD
LN_EPS  = 1e-5

NTOKEN_PAD = 128          # lane-dense decoder output (pad 32 -> 128 lanes)
SLAB_COLS  = 128          # weight slab padded to a full 128-lane width

# --------------------- packed per-layer weight-slab layout -------------------
# bf16 matmul weights; each block starts at a 16-row boundary, columns at lane 0.
ROW_WQ = 0                     # (D, D)
ROW_WK = ROW_WQ + NINP         # (D, D)
ROW_WV = ROW_WK + NINP         # (D, D)
ROW_WO = ROW_WV + NINP         # (D, D)
ROW_W1 = ROW_WO + NINP         # (D, NHID)
ROW_W2 = ROW_W1 + NINP         # (NHID, D)
W_SLAB_ROWS = ROW_W2 + NHID    # 112

# f32 bias / LayerNorm vectors: one per row of a (VEC_ROWS, 128) block.
VEC_BQ, VEC_BK, VEC_BV, VEC_BO = 0, 1, 2, 3
VEC_B1, VEC_B2 = 4, 5
VEC_LN1W, VEC_LN1B, VEC_LN2W, VEC_LN2B = 6, 7, 8, 9
VEC_ROWS = 16


# ================================ Pallas kernel ===============================

def _layernorm(x, w, b):
    mu = jnp.mean(x, axis=-1, keepdims=True)
    xc = x - mu
    var = jnp.mean(xc * xc, axis=-1, keepdims=True)
    return xc * jax.lax.rsqrt(var + LN_EPS) * w + b


def fused_forward_kernel(ids_ref, pe_ref, mask_ref, emb_ref, w_ref, vec_ref,
                         decw_ref, decb_ref, o_ref):
    """Forward for one batch block: (BB*S, 1) ids -> (BB*S, 128) logits."""
    M = ids_ref.shape[0]            # BB * S rows
    D = NINP
    inv_sqrt_hd = 1.0 / math.sqrt(HEAD_DIM)

    # Per-head lane masks, built once (heads = contiguous 8-lane column groups).
    lane = jax.lax.broadcasted_iota(jnp.int32, (1, D), 1)
    hmask = [((lane >= h * HEAD_DIM) & (lane < (h + 1) * HEAD_DIM)).astype(jnp.float32)
             for h in range(NHEAD)]

    # ---- embedding (one-hot matmul on MXU) * sqrt(D) + batch-indexed PE ----
    ids = ids_ref[...]                                              # (M, 1) int32
    tok = jax.lax.broadcasted_iota(jnp.int32, (M, NTOKEN), 1)
    onehot = (tok == ids).astype(jnp.bfloat16)                      # (M, NTOKEN)
    x = jnp.dot(onehot, emb_ref[...], preferred_element_type=jnp.float32)
    x = x * math.sqrt(D) + pe_ref[...]                              # (M, D) f32

    mask = mask_ref[...]                                            # (M, M) block-diag causal

    # ---- encoder layers (static unroll, NLAYERS=2) ----
    for l in range(NLAYERS):
        # resident bf16 weights: static ref-level slices, all 16-row aligned
        wq = w_ref[l, ROW_WQ:ROW_WQ + D, :D]
        wk = w_ref[l, ROW_WK:ROW_WK + D, :D]
        wv = w_ref[l, ROW_WV:ROW_WV + D, :D]
        wo = w_ref[l, ROW_WO:ROW_WO + D, :D]
        w1 = w_ref[l, ROW_W1:ROW_W1 + D, :NHID]
        w2 = w_ref[l, ROW_W2:ROW_W2 + NHID, :D]

        # one (16, 128) f32 load for all bias / LN vectors, sliced in-register
        vec = vec_ref[l, :, :]
        bq   = vec[VEC_BQ:VEC_BQ + 1, :D]
        bk   = vec[VEC_BK:VEC_BK + 1, :D]
        bv   = vec[VEC_BV:VEC_BV + 1, :D]
        bo   = vec[VEC_BO:VEC_BO + 1, :D]
        b1   = vec[VEC_B1:VEC_B1 + 1, :NHID]
        b2   = vec[VEC_B2:VEC_B2 + 1, :D]
        ln1w = vec[VEC_LN1W:VEC_LN1W + 1, :D]
        ln1b = vec[VEC_LN1B:VEC_LN1B + 1, :D]
        ln2w = vec[VEC_LN2W:VEC_LN2W + 1, :D]
        ln2b = vec[VEC_LN2B:VEC_LN2B + 1, :D]

        # ---- multi-head self-attention (block-diagonal over batch block) ----
        xb = x.astype(jnp.bfloat16)
        q = jnp.dot(xb, wq, preferred_element_type=jnp.float32) + bq   # (M, D)
        k = jnp.dot(xb, wk, preferred_element_type=jnp.float32) + bk
        v = jnp.dot(xb, wv, preferred_element_type=jnp.float32) + bv

        ctx = None
        for h in range(NHEAD):                       # static unroll, NHEAD=2
            # lane-mask the head's columns: masked lanes contribute exact zeros
            # to the contraction, so no sub-128 lane slicing is needed.
            qh = (q * hmask[h]) * inv_sqrt_hd
            sc = jax.lax.dot_general(qh, k, (((1,), (1,)), ((), ())),
                                     preferred_element_type=jnp.float32)  # (M, M)
            sc = sc + mask                            # causal + cross-batch -inf
            mrow = jnp.max(sc, axis=-1, keepdims=True)
            p = jnp.exp(sc - mrow)
            p = p / jnp.sum(p, axis=-1, keepdims=True)   # exact softmax
            vh = v * hmask[h]
            ctxh = jnp.dot(p, vh, preferred_element_type=jnp.float32)     # (M, D)
            ctx = ctxh if ctx is None else ctx + ctxh

        attn = jnp.dot(ctx.astype(jnp.bfloat16), wo,
                       preferred_element_type=jnp.float32) + bo

        # residual + layernorm 1 (dropout = identity in eval mode)
        x = _layernorm(x + attn, ln1w, ln1b)

        # ---- feed-forward ----
        h1 = jnp.maximum(
            jnp.dot(x.astype(jnp.bfloat16), w1,
                    preferred_element_type=jnp.float32) + b1, 0.0)
        h2 = jnp.dot(h1.astype(jnp.bfloat16), w2,
                     preferred_element_type=jnp.float32) + b2

        # residual + layernorm 2
        x = _layernorm(x + h2, ln2w, ln2b)

    # ---- decoder: lane-dense (M, 128) store; padded vocab lanes hold zeros ----
    o_ref[...] = (jnp.dot(x.astype(jnp.bfloat16), decw_ref[...],
                          preferred_element_type=jnp.float32) + decb_ref[...])


# ============================== weight packing glue ===========================

def _pad_cols(a, cols=SLAB_COLS):
    a = jnp.asarray(a, jnp.float32)
    return jnp.pad(a, ((0, 0), (0, cols - a.shape[1])))


def _vec_row(v, cols=SLAB_COLS):
    v = jnp.asarray(v, jnp.float32).reshape(1, -1)
    return jnp.pad(v, ((0, 0), (0, cols - v.shape[1])))


def pack_weight_slab(layers):
    """bf16 matmul weights: (NLAYERS, W_SLAB_ROWS=112, 128)."""
    D = NINP
    slabs = []
    for lp in layers:
        wq = lp["in_proj_w"][0 * D:1 * D, :].T           # (D, D)
        wk = lp["in_proj_w"][1 * D:2 * D, :].T
        wv = lp["in_proj_w"][2 * D:3 * D, :].T
        blocks = [
            _pad_cols(wq), _pad_cols(wk), _pad_cols(wv),
            _pad_cols(lp["out_proj_w"].T),               # (D, D)
            _pad_cols(lp["lin1_w"].T),                   # (D, NHID)
            _pad_cols(lp["lin2_w"].T),                   # (NHID, D)
        ]
        slabs.append(jnp.concatenate(blocks, axis=0))
    return jnp.stack(slabs, axis=0).astype(jnp.bfloat16)


def pack_vec_slab(layers):
    """f32 bias / LayerNorm vectors: (NLAYERS, VEC_ROWS=16, 128)."""
    D = NINP
    slabs = []
    for lp in layers:
        rows = [
            _vec_row(lp["in_proj_b"][0 * D:1 * D]),
            _vec_row(lp["in_proj_b"][1 * D:2 * D]),
            _vec_row(lp["in_proj_b"][2 * D:3 * D]),
            _vec_row(lp["out_proj_b"]),
            _vec_row(lp["lin1_b"]),
            _vec_row(lp["lin2_b"]),
            _vec_row(lp["ln1_w"]), _vec_row(lp["ln1_b"]),
            _vec_row(lp["ln2_w"]), _vec_row(lp["ln2_b"]),
        ]
        rows += [jnp.zeros((1, SLAB_COLS), jnp.float32)] * (VEC_ROWS - len(rows))
        slabs.append(jnp.concatenate(rows, axis=0))
    return jnp.stack(slabs, axis=0)


def make_blockdiag_causal_mask(bb, s):
    """(bb*s, bb*s) mask: causal inside each batch element, -inf across them."""
    causal = np.where(np.tril(np.ones((s, s), dtype=bool)), 0.0, -np.inf)
    big = np.full((bb * s, bb * s), -np.inf, dtype=np.float32)
    for b in range(bb):
        big[b * s:(b + 1) * s, b * s:(b + 1) * s] = causal
    return jnp.asarray(big)


# ============================== pallas_call wrapper ===========================

def transformer_forward(ids, params, pe_batch):
    B, S = ids.shape
    D = NINP
    # 2 "parallel" grid steps when possible (keeps both v7x TensorCores busy;
    # only 2 steps so v5e/v6e per-step overhead stays negligible).  Each step
    # processes BB batch elements -> every matmul has an M = BB*S row slab.
    nsteps = 2 if (B >= 2 and B % 2 == 0) else 1
    BB = B // nsteps
    M = BB * S

    ids_flat = ids.reshape(B * S, 1).astype(jnp.int32)
    # PositionalEncoding quirk: PE row indexed by BATCH index, broadcast over
    # the sequence.  Pre-broadcast host-side so the kernel only adds it.
    pe_flat = jnp.broadcast_to(pe_batch[:, None, :].astype(jnp.float32),
                               (B, S, D)).reshape(B * S, D)
    mask_bd = make_blockdiag_causal_mask(BB, S)               # (M, M) f32, resident
    w_slab = pack_weight_slab(params["layers"])               # (L, 112, 128) bf16
    vec_slab = pack_vec_slab(params["layers"])                # (L, 16, 128) f32
    emb_bf = params["emb"].astype(jnp.bfloat16)               # (NTOKEN, D)
    dec_w = jnp.zeros((D, NTOKEN_PAD), jnp.float32).at[:, :NTOKEN].set(
        params["dec_w"].T).astype(jnp.bfloat16)               # lane-dense decoder
    dec_b = jnp.zeros((1, NTOKEN_PAD), jnp.float32).at[:, :NTOKEN].set(
        params["dec_b"].reshape(1, NTOKEN))

    out = pl.pallas_call(
        fused_forward_kernel,
        out_shape=jax.ShapeDtypeStruct((B * S, NTOKEN_PAD), jnp.float32),
        grid=(nsteps,),
        in_specs=[
            pl.BlockSpec((M, 1), lambda b: (b, 0)),                    # token ids
            pl.BlockSpec((M, D), lambda b: (b, 0)),                    # PE rows
            pl.BlockSpec((M, M), lambda b: (0, 0)),                    # block-diag mask (resident)
            pl.BlockSpec((NTOKEN, D), lambda b: (0, 0)),               # embedding table (resident)
            pl.BlockSpec((NLAYERS, W_SLAB_ROWS, SLAB_COLS),
                         lambda b: (0, 0, 0)),                         # bf16 weight slab (resident)
            pl.BlockSpec((NLAYERS, VEC_ROWS, SLAB_COLS),
                         lambda b: (0, 0, 0)),                         # f32 bias/LN slab (resident)
            pl.BlockSpec((D, NTOKEN_PAD), lambda b: (0, 0)),           # decoder W^T, padded to 128 lanes
            pl.BlockSpec((1, NTOKEN_PAD), lambda b: (0, 0)),           # decoder bias, padded
        ],
        out_specs=pl.BlockSpec((M, NTOKEN_PAD), lambda b: (b, 0)),     # lane-dense store
        compiler_params=pltpu.CompilerParams(dimension_semantics=("parallel",)),
    )(ids_flat, pe_flat, mask_bd, emb_bf, w_slab, vec_slab, dec_w, dec_b)

    return out.reshape(B, S, NTOKEN_PAD)[:, :, :NTOKEN]


# ============================ params / mask / PE glue =========================

def _bf16_round(a):
    # Matmul weights are fed to the kernel in bf16; round them at init so the
    # f32 reference and the kernel share bit-identical weight values.
    return a.astype(jnp.bfloat16).astype(jnp.float32)


def init_params(key):
    keys = jax.random.split(key, 2 + NLAYERS)
    initrange = 0.1
    emb = _bf16_round(jax.random.uniform(keys[0], (NTOKEN, NINP), jnp.float32,
                                         -initrange, initrange))
    dec_w = _bf16_round(jax.random.uniform(keys[1], (NTOKEN, NINP), jnp.float32,
                                           -initrange, initrange))
    dec_b = jnp.zeros((NTOKEN,), jnp.float32)
    layers = []
    for i in range(NLAYERS):
        lk = jax.random.split(keys[2 + i], 4)
        layers.append(dict(
            in_proj_w=_bf16_round(jax.random.normal(lk[0], (3 * NINP, NINP), jnp.float32)
                                  * (1.0 / math.sqrt(NINP))),
            in_proj_b=jnp.zeros((3 * NINP,), jnp.float32),
            out_proj_w=_bf16_round(jax.random.normal(lk[1], (NINP, NINP), jnp.float32)
                                   * (1.0 / math.sqrt(NINP))),
            out_proj_b=jnp.zeros((NINP,), jnp.float32),
            lin1_w=_bf16_round(jax.random.normal(lk[2], (NHID, NINP), jnp.float32)
                               * (1.0 / math.sqrt(NINP))),
            lin1_b=jnp.zeros((NHID,), jnp.float32),
            lin2_w=_bf16_round(jax.random.normal(lk[3], (NINP, NHID), jnp.float32)
                               * (1.0 / math.sqrt(NHID))),
            lin2_b=jnp.zeros((NINP,), jnp.float32),
            ln1_w=jnp.ones((NINP,), jnp.float32),
            ln1_b=jnp.zeros((NINP,), jnp.float32),
            ln2_w=jnp.ones((NINP,), jnp.float32),
            ln2_b=jnp.zeros((NINP,), jnp.float32),
        ))
    return dict(emb=emb, dec_w=dec_w, dec_b=dec_b, layers=layers)


def make_causal_mask(S):
    tril = np.tril(np.ones((S, S), dtype=bool))
    return jnp.asarray(np.where(tril, 0.0, -np.inf).astype(np.float32))


def make_pe_table(max_len, d_model):
    position = np.arange(max_len, dtype=np.float32)[:, None]
    div_term = np.exp(np.arange(0, d_model, 2, dtype=np.float32)
                      * (-math.log(10000.0) / d_model))
    pe = np.zeros((max_len, d_model), dtype=np.float32)
    pe[:, 0::2] = np.sin(position * div_term)
    pe[:, 1::2] = np.cos(position * div_term)
    return jnp.asarray(pe)


# ============================== pure-JAX reference ============================

_HI = jax.lax.Precision.HIGHEST


def _ref_layernorm(x, w, b):
    mu = jnp.mean(x, axis=-1, keepdims=True)
    xc = x - mu
    var = jnp.mean(xc * xc, axis=-1, keepdims=True)
    return xc / jnp.sqrt(var + LN_EPS) * w + b


def _ref_layer(x, mask, lp):
    B, S, D = x.shape
    hd = D // NHEAD
    qkv = jnp.einsum("bsd,ed->bse", x, lp["in_proj_w"], precision=_HI) + lp["in_proj_b"]
    q, k, v = jnp.split(qkv, 3, axis=-1)

    def heads(t):
        return t.reshape(B, S, NHEAD, hd).transpose(0, 2, 1, 3)

    q, k, v = heads(q), heads(k), heads(v)
    scores = jnp.einsum("bhqe,bhke->bhqk", q, k, precision=_HI) / math.sqrt(hd) + mask
    p = jax.nn.softmax(scores, axis=-1)
    ctx = jnp.einsum("bhqk,bhke->bhqe", p, v, precision=_HI)
    ctx = ctx.transpose(0, 2, 1, 3).reshape(B, S, D)
    attn = jnp.einsum("bsd,ed->bse", ctx, lp["out_proj_w"], precision=_HI) + lp["out_proj_b"]
    x = _ref_layernorm(x + attn, lp["ln1_w"], lp["ln1_b"])
    h1 = jax.nn.relu(jnp.einsum("bsd,hd->bsh", x, lp["lin1_w"], precision=_HI) + lp["lin1_b"])
    h2 = jnp.einsum("bsh,dh->bsd", h1, lp["lin2_w"], precision=_HI) + lp["lin2_b"]
    return _ref_layernorm(x + h2, lp["ln2_w"], lp["ln2_b"])


def reference_forward(ids, params, mask, pe_batch):
    x = params["emb"][ids] * math.sqrt(NINP)
    x = x + pe_batch[:, None, :]          # PE indexed by batch, as in the module
    for lp in params["layers"]:
        x = _ref_layer(x, mask, lp)
    return jnp.einsum("bsd,td->bst", x, params["dec_w"], precision=_HI) + params["dec_b"]


# ==================================== main ====================================

if __name__ == "__main__":
    B, S = 8, 8          # kernel blocks this into 2 grid steps of BB=4 examples
    key = jax.random.PRNGKey(0)
    k_ids, k_params = jax.random.split(key)

    ids = jax.random.randint(k_ids, (B, S), 0, NTOKEN, dtype=jnp.int32)
    params = init_params(k_params)
    mask = make_causal_mask(S)
    pe_table = make_pe_table(64, NINP)
    pe_batch = pe_table[:B]               # (B, D): quirky batch-indexed PE slice

    logits = jax.block_until_ready(transformer_forward(ids, params, pe_batch))
    ref = jax.block_until_ready(reference_forward(ids, params, mask, pe_batch))

    assert logits.shape == (B, S, NTOKEN) and logits.dtype == jnp.float32
    # Kernel weight matmuls use bf16 operands (weights are bf16-rounded at init
    # so kernel and f32 reference share identical weights; the only divergence
    # is bf16 rounding of activations at the weight matmuls).
    np.testing.assert_allclose(np.asarray(logits), np.asarray(ref),
                               atol=2e-2, rtol=2e-2)
    print("KERNEL_OK")
</pallas_src>

<mosaic_0001>
module attributes {stable_mosaic.version = 11 : i64} {
  func.func @fused_forward_kernel(%arg0: i32, %arg1: memref<32x1xi32, #tpu.memory_space<vmem>>, %arg2: memref<32x16xf32, #tpu.memory_space<vmem>>, %arg3: memref<32x32xf32, #tpu.memory_space<vmem>>, %arg4: memref<32x16xbf16, #tpu.memory_space<vmem>>, %arg5: memref<2x112x128xbf16, #tpu.memory_space<vmem>>, %arg6: memref<2x16x128xf32, #tpu.memory_space<vmem>>, %arg7: memref<16x128xbf16, #tpu.memory_space<vmem>>, %arg8: memref<1x128xf32, #tpu.memory_space<vmem>>, %arg9: memref<32x128xf32, #tpu.memory_space<vmem>>) attributes {dimension_semantics = [#tpu.dimension_semantics<parallel>], iteration_bounds = array<i64: 2>, scalar_prefetch = 0 : i64, scratch_operands = 0 : i64, tpu.core_type = #tpu.core_type<tc>, window_params = [{transform_indices = @transform_0, window_bounds = array<i64: 32, 1>}, {transform_indices = @transform_1, window_bounds = array<i64: 32, 16>}, {pipeline_mode = #tpu.pipeline_mode<synchronous>, transform_indices = @transform_2, window_bounds = array<i64: 32, 32>}, {pipeline_mode = #tpu.pipeline_mode<synchronous>, transform_indices = @transform_3, window_bounds = array<i64: 32, 16>}, {pipeline_mode = #tpu.pipeline_mode<synchronous>, transform_indices = @transform_4, window_bounds = array<i64: 2, 112, 128>}, {pipeline_mode = #tpu.pipeline_mode<synchronous>, transform_indices = @transform_5, window_bounds = array<i64: 2, 16, 128>}, {pipeline_mode = #tpu.pipeline_mode<synchronous>, transform_indices = @transform_6, window_bounds = array<i64: 16, 128>}, {pipeline_mode = #tpu.pipeline_mode<synchronous>, transform_indices = @transform_7, window_bounds = array<i64: 1, 128>}, {transform_indices = @transform_8, window_bounds = array<i64: 32, 128>}]} {
    %0 = tpu.iota {dimensions = array<i32: 1>} : vector<1x16xi32>
    %c0_i32 = arith.constant 0 : i32
    %1 = vector.broadcast %c0_i32 : i32 to vector<1x16xi32>
    %2 = arith.cmpi sge, %0, %1 : vector<1x16xi32>
    %c8_i32 = arith.constant 8 : i32
    %3 = vector.broadcast %c8_i32 : i32 to vector<1x16xi32>
    %4 = arith.cmpi slt, %0, %3 : vector<1x16xi32>
    %5 = arith.andi %2, %4 : vector<1x16xi1>
    %6 = arith.extui %5 : vector<1x16xi1> to vector<1x16xi32>
    %7 = arith.sitofp %6 : vector<1x16xi32> to vector<1x16xf32>
    %c8_i32_0 = arith.constant 8 : i32
    %8 = vector.broadcast %c8_i32_0 : i32 to vector<1x16xi32>
    %9 = arith.cmpi sge, %0, %8 : vector<1x16xi32>
    %c16_i32 = arith.constant 16 : i32
    %10 = vector.broadcast %c16_i32 : i32 to vector<1x16xi32>
    %11 = arith.cmpi slt, %0, %10 : vector<1x16xi32>
    %12 = arith.andi %9, %11 : vector<1x16xi1>
    %13 = arith.extui %12 : vector<1x16xi1> to vector<1x16xi32>
    %14 = arith.sitofp %13 : vector<1x16xi32> to vector<1x16xf32>
    %c0 = arith.constant 0 : index
    %c0_1 = arith.constant 0 : index
    %15 = vector.load %arg1[%c0, %c0_1] : memref<32x1xi32, #tpu.memory_space<vmem>>, vector<32x1xi32>
    %16 = tpu.iota {dimensions = array<i32: 1>} : vector<32x32xi32>
    %17 = vector.broadcast %15 : vector<32x1xi32> to vector<32x32xi32>
    %18 = arith.cmpi eq, %16, %17 : vector<32x32xi32>
    %19 = arith.extui %18 : vector<32x32xi1> to vector<32x32xi32>
    %20 = arith.sitofp %19 : vector<32x32xi32> to vector<32x32xf32>
    %21 = arith.truncf %20 : vector<32x32xf32> to vector<32x32xbf16>
    %c0_2 = arith.constant 0 : index
    %c0_3 = arith.constant 0 : index
    %22 = vector.load %arg4[%c0_2, %c0_3] : memref<32x16xbf16, #tpu.memory_space<vmem>>, vector<32x16xbf16>
    %cst = arith.constant dense<0.000000e+00> : vector<32x16xf32>
    %23 = tpu.matmul %21, %22, %cst {dimension_numbers = #tpu.dot_dimension_numbers<[1], [0], [0], [1], [0, 0, 1, 1], [], []>} : vector<32x32xbf16>, vector<32x16xbf16>, vector<32x16xf32> -> vector<32x16xf32>
    %cst_4 = arith.constant 4.000000e+00 : f32
    %24 = vector.broadcast %cst_4 : f32 to vector<32x16xf32>
    %25 = arith.mulf %23, %24 : vector<32x16xf32>
    %c0_5 = arith.constant 0 : index
    %c0_6 = arith.constant 0 : index
    %26 = vector.load %arg2[%c0_5, %c0_6] : memref<32x16xf32, #tpu.memory_space<vmem>>, vector<32x16xf32>
    %27 = arith.addf %25, %26 : vector<32x16xf32>
    %c0_7 = arith.constant 0 : index
    %c0_8 = arith.constant 0 : index
    %28 = vector.load %arg3[%c0_7, %c0_8] : memref<32x32xf32, #tpu.memory_space<vmem>>, vector<32x32xf32>
    %c0_9 = arith.constant 0 : index
    %c0_10 = arith.constant 0 : index
    %c0_11 = arith.constant 0 : index
    %29 = vector.load %arg5[%c0_9, %c0_10, %c0_11] : memref<2x112x128xbf16, #tpu.memory_space<vmem>>, vector<1x16x16xbf16>
    %30 = vector.shape_cast %29 : vector<1x16x16xbf16> to vector<16x16xbf16>
    %c0_12 = arith.constant 0 : index
    %c16 = arith.constant 16 : index
    %c0_13 = arith.constant 0 : index
    %31 = vector.load %arg5[%c0_12, %c16, %c0_13] : memref<2x112x128xbf16, #tpu.memory_space<vmem>>, vector<1x16x16xbf16>
    %32 = vector.shape_cast %31 : vector<1x16x16xbf16> to vector<16x16xbf16>
    %c0_14 = arith.constant 0 : index
    %c32 = arith.constant 32 : index
    %c0_15 = arith.constant 0 : index
    %33 = vector.load %arg5[%c0_14, %c32, %c0_15] : memref<2x112x128xbf16, #tpu.memory_space<vmem>>, vector<1x16x16xbf16>
    %34 = vector.shape_cast %33 : vector<1x16x16xbf16> to vector<16x16xbf16>
    %c0_16 = arith.constant 0 : index
    %c48 = arith.constant 48 : index
    %c0_17 = arith.constant 0 : index
    %35 = vector.load %arg5[%c0_16, %c48, %c0_17] : memref<2x112x128xbf16, #tpu.memory_space<vmem>>, vector<1x16x16xbf16>
    %36 = vector.shape_cast %35 : vector<1x16x16xbf16> to vector<16x16xbf16>
    %c0_18 = arith.constant 0 : index
    %c64 = arith.constant 64 : index
    %c0_19 = arith.constant 0 : index
    %37 = vector.load %arg5[%c0_18, %c64, %c0_19] : memref<2x112x128xbf16, #tpu.memory_space<vmem>>, vector<1x16x32xbf16>
    %38 = vector.shape_cast %37 : vector<1x16x32xbf16> to vector<16x32xbf16>
    %c0_20 = arith.constant 0 : index
    %c80 = arith.constant 80 : index
    %c0_21 = arith.constant 0 : index
    %39 = vector.load %arg5[%c0_20, %c80, %c0_21] : memref<2x112x128xbf16, #tpu.memory_space<vmem>>, vector<1x32x16xbf16>
    %40 = vector.shape_cast %39 : vector<1x32x16xbf16> to vector<32x16xbf16>
    %c0_22 = arith.constant 0 : index
    %c0_23 = arith.constant 0 : index
    %c0_24 = arith.constant 0 : index
    %41 = vector.load %arg6[%c0_22, %c0_23, %c0_24] : memref<2x16x128xf32, #tpu.memory_space<vmem>>, vector<1x16x128xf32>
    %42 = vector.shape_cast %41 : vector<1x16x128xf32> to vector<16x128xf32>
    %43 = vector.extract_strided_slice %42 {offsets = [0, 0], sizes = [1, 16], strides = [1, 1]} : vector<16x128xf32> to vector<1x16xf32>
    %44 = vector.extract_strided_slice %42 {offsets = [1, 0], sizes = [1, 16], strides = [1, 1]} : vector<16x128xf32> to vector<1x16xf32>
    %45 = vector.extract_strided_slice %42 {offsets = [2, 0], sizes = [1, 16], strides = [1, 1]} : vector<16x128xf32> to vector<1x16xf32>
    %46 = vector.extract_strided_slice %42 {offsets = [3, 0], sizes = [1, 16], strides = [1, 1]} : vector<16x128xf32> to vector<1x16xf32>
    %47 = vector.extract_strided_slice %42 {offsets = [4, 0], sizes = [1, 32], strides = [1, 1]} : vector<16x128xf32> to vector<1x32xf32>
    %48 = vector.extract_strided_slice %42 {offsets = [5, 0], sizes = [1, 16], strides = [1, 1]} : vector<16x128xf32> to vector<1x16xf32>
    %49 = vector.extract_strided_slice %42 {offsets = [6, 0], sizes = [1, 16], strides = [1, 1]} : vector<16x128xf32> to vector<1x16xf32>
    %50 = vector.extract_strided_slice %42 {offsets = [7, 0], sizes = [1, 16], strides = [1, 1]} : vector<16x128xf32> to vector<1x16xf32>
    %51 = vector.extract_strided_slice %42 {offsets = [8, 0], sizes = [1, 16], strides = [1, 1]} : vector<16x128xf32> to vector<1x16xf32>
    %52 = vector.extract_strided_slice %42 {offsets = [9, 0], sizes = [1, 16], strides = [1, 1]} : vector<16x128xf32> to vector<1x16xf32>
    %53 = arith.truncf %27 : vector<32x16xf32> to vector<32x16xbf16>
    %cst_25 = arith.constant dense<0.000000e+00> : vector<32x16xf32>
    %54 = tpu.matmul %53, %30, %cst_25 {dimension_numbers = #tpu.dot_dimension_numbers<[1], [0], [0], [1], [0, 0, 1, 1], [], []>} : vector<32x16xbf16>, vector<16x16xbf16>, vector<32x16xf32> -> vector<32x16xf32>
    %55 = vector.broadcast %43 : vector<1x16xf32> to vector<32x16xf32>
    %56 = arith.addf %54, %55 : vector<32x16xf32>
    %cst_26 = arith.constant dense<0.000000e+00> : vector<32x16xf32>
    %57 = tpu.matmul %53, %32, %cst_26 {dimension_numbers = #tpu.dot_dimension_numbers<[1], [0], [0], [1], [0, 0, 1, 1], [], []>} : vector<32x16xbf16>, vector<16x16xbf16>, vector<32x16xf32> -> vector<32x16xf32>
    %58 = vector.broadcast %44 : vector<1x16xf32> to vector<32x16xf32>
    %59 = arith.addf %57, %58 : vector<32x16xf32>
    %cst_27 = arith.constant dense<0.000000e+00> : vector<32x16xf32>
    %60 = tpu.matmul %53, %34, %cst_27 {dimension_numbers = #tpu.dot_dimension_numbers<[1], [0], [0], [1], [0, 0, 1, 1], [], []>} : vector<32x16xbf16>, vector<16x16xbf16>, vector<32x16xf32> -> vector<32x16xf32>
    %61 = vector.broadcast %45 : vector<1x16xf32> to vector<32x16xf32>
    %62 = arith.addf %60, %61 : vector<32x16xf32>
    %63 = vector.broadcast %7 : vector<1x16xf32> to vector<32x16xf32>
    %64 = arith.mulf %56, %63 : vector<32x16xf32>
    %cst_28 = arith.constant 0.353553385 : f32
    %65 = vector.broadcast %cst_28 : f32 to vector<32x16xf32>
    %66 = arith.mulf %64, %65 : vector<32x16xf32>
    %cst_29 = arith.constant dense<0.000000e+00> : vector<32x32xf32>
    %67 = tpu.matmul %66, %59, %cst_29 {dimension_numbers = #tpu.dot_dimension_numbers<[1], [1], [0], [0], [0, 0, 1, 0], [], []>} : vector<32x16xf32>, vector<32x16xf32>, vector<32x32xf32> -> vector<32x32xf32>
    %68 = arith.addf %67, %28 : vector<32x32xf32>
    %cst_30 = arith.constant dense<0xFF800000> : vector<32xf32>
    %69 = vector.multi_reduction <maximumf>, %68, %cst_30 [1] : vector<32x32xf32> to vector<32xf32>
    %70 = vector.shape_cast %69 : vector<32xf32> to vector<32x1xf32>
    %71 = vector.broadcast %70 : vector<32x1xf32> to vector<32x32xf32>
    %72 = arith.subf %68, %71 : vector<32x32xf32>
    %73 = math.exp %72 : vector<32x32xf32>
    %cst_31 = arith.constant dense<0.000000e+00> : vector<32xf32>
    %74 = vector.multi_reduction <add>, %73, %cst_31 [1] : vector<32x32xf32> to vector<32xf32>
    %75 = vector.shape_cast %74 : vector<32xf32> to vector<32x1xf32>
    %76 = vector.broadcast %75 : vector<32x1xf32> to vector<32x32xf32>
    %77 = arith.divf %73, %76 : vector<32x32xf32>
    %78 = vector.broadcast %7 : vector<1x16xf32> to vector<32x16xf32>
    %79 = arith.mulf %62, %78 : vector<32x16xf32>
    %cst_32 = arith.constant dense<0.000000e+00> : vector<32x16xf32>
    %80 = tpu.matmul %77, %79, %cst_32 {dimension_numbers = #tpu.dot_dimension_numbers<[1], [0], [0], [1], [0, 0, 1, 1], [], []>} : vector<32x32xf32>, vector<32x16xf32>, vector<32x16xf32> -> vector<32x16xf32>
    %81 = vector.broadcast %14 : vector<1x16xf32> to vector<32x16xf32>
    %82 = arith.mulf %56, %81 : vector<32x16xf32>
    %cst_33 = arith.constant 0.353553385 : f32
    %83 = vector.broadcast %cst_33 : f32 to vector<32x16xf32>
    %84 = arith.mulf %82, %83 : vector<32x16xf32>
    %cst_34 = arith.constant dense<0.000000e+00> : vector<32x32xf32>
    %85 = tpu.matmul %84, %59, %cst_34 {dimension_numbers = #tpu.dot_dimension_numbers<[1], [1], [0], [0], [0, 0, 1, 0], [], []>} : vector<32x16xf32>, vector<32x16xf32>, vector<32x32xf32> -> vector<32x32xf32>
    %86 = arith.addf %85, %28 : vector<32x32xf32>
    %cst_35 = arith.constant dense<0xFF800000> : vector<32xf32>
    %87 = vector.multi_reduction <maximumf>, %86, %cst_35 [1] : vector<32x32xf32> to vector<32xf32>
    %88 = vector.shape_cast %87 : vector<32xf32> to vector<32x1xf32>
    %89 = vector.broadcast %88 : vector<32x1xf32> to vector<32x32xf32>
    %90 = arith.subf %86, %89 : vector<32x32xf32>
    %91 = math.exp %90 : vector<32x32xf32>
    %cst_36 = arith.constant dense<0.000000e+00> : vector<32xf32>
    %92 = vector.multi_reduction <add>, %91, %cst_36 [1] : vector<32x32xf32> to vector<32xf32>
    %93 = vector.shape_cast %92 : vector<32xf32> to vector<32x1xf32>
    %94 = vector.broadcast %93 : vector<32x1xf32> to vector<32x32xf32>
    %95 = arith.divf %91, %94 : vector<32x32xf32>
    %96 = vector.broadcast %14 : vector<1x16xf32> to vector<32x16xf32>
    %97 = arith.mulf %62, %96 : vector<32x16xf32>
    %cst_37 = arith.constant dense<0.000000e+00> : vector<32x16xf32>
    %98 = tpu.matmul %95, %97, %cst_37 {dimension_numbers = #tpu.dot_dimension_numbers<[1], [0], [0], [1], [0, 0, 1, 1], [], []>} : vector<32x32xf32>, vector<32x16xf32>, vector<32x16xf32> -> vector<32x16xf32>
    %99 = arith.addf %80, %98 : vector<32x16xf32>
    %100 = arith.truncf %99 : vector<32x16xf32> to vector<32x16xbf16>
    %cst_38 = arith.constant dense<0.000000e+00> : vector<32x16xf32>
    %101 = tpu.matmul %100, %36, %cst_38 {dimension_numbers = #tpu.dot_dimension_numbers<[1], [0], [0], [1], [0, 0, 1, 1], [], []>} : vector<32x16xbf16>, vector<16x16xbf16>, vector<32x16xf32> -> vector<32x16xf32>
    %102 = vector.broadcast %46 : vector<1x16xf32> to vector<32x16xf32>
    %103 = arith.addf %101, %102 : vector<32x16xf32>
    %104 = arith.addf %27, %103 : vector<32x16xf32>
    %cst_39 = arith.constant dense<0.000000e+00> : vector<32xf32>
    %105 = vector.multi_reduction <add>, %104, %cst_39 [1] : vector<32x16xf32> to vector<32xf32>
    %106 = vector.shape_cast %105 : vector<32xf32> to vector<32x1xf32>
    %cst_40 = arith.constant 1.600000e+01 : f32
    %107 = vector.broadcast %cst_40 : f32 to vector<32x1xf32>
    %108 = arith.divf %106, %107 : vector<32x1xf32>
    %109 = vector.broadcast %108 : vector<32x1xf32> to vector<32x16xf32>
    %110 = arith.subf %104, %109 : vector<32x16xf32>
    %111 = arith.mulf %110, %110 : vector<32x16xf32>
    %cst_41 = arith.constant dense<0.000000e+00> : vector<32xf32>
    %112 = vector.multi_reduction <add>, %111, %cst_41 [1] : vector<32x16xf32> to vector<32xf32>
    %113 = vector.shape_cast %112 : vector<32xf32> to vector<32x1xf32>
    %cst_42 = arith.constant 1.600000e+01 : f32
    %114 = vector.broadcast %cst_42 : f32 to vector<32x1xf32>
    %115 = arith.divf %113, %114 : vector<32x1xf32>
    %cst_43 = arith.constant 9.99999974E-6 : f32
    %116 = vector.broadcast %cst_43 : f32 to vector<32x1xf32>
    %117 = arith.addf %115, %116 : vector<32x1xf32>
    %118 = math.rsqrt %117 : vector<32x1xf32>
    %119 = vector.broadcast %118 : vector<32x1xf32> to vector<32x16xf32>
    %120 = arith.mulf %110, %119 : vector<32x16xf32>
    %121 = vector.broadcast %49 : vector<1x16xf32> to vector<32x16xf32>
    %122 = arith.mulf %120, %121 : vector<32x16xf32>
    %123 = vector.broadcast %50 : vector<1x16xf32> to vector<32x16xf32>
    %124 = arith.addf %122, %123 : vector<32x16xf32>
    %125 = arith.truncf %124 : vector<32x16xf32> to vector<32x16xbf16>
    %cst_44 = arith.constant dense<0.000000e+00> : vector<32x32xf32>
    %126 = tpu.matmul %125, %38, %cst_44 {dimension_numbers = #tpu.dot_dimension_numbers<[1], [0], [0], [1], [0, 0, 1, 1], [], []>} : vector<32x16xbf16>, vector<16x32xbf16>, vector<32x32xf32> -> vector<32x32xf32>
    %127 = vector.broadcast %47 : vector<1x32xf32> to vector<32x32xf32>
    %128 = arith.addf %126, %127 : vector<32x32xf32>
    %cst_45 = arith.constant 0.000000e+00 : f32
    %129 = vector.broadcast %cst_45 : f32 to vector<32x32xf32>
    %130 = arith.maximumf %128, %129 : vector<32x32xf32>
    %131 = arith.truncf %130 : vector<32x32xf32> to vector<32x32xbf16>
    %cst_46 = arith.constant dense<0.000000e+00> : vector<32x16xf32>
    %132 = tpu.matmul %131, %40, %cst_46 {dimension_numbers = #tpu.dot_dimension_numbers<[1], [0], [0], [1], [0, 0, 1, 1], [], []>} : vector<32x32xbf16>, vector<32x16xbf16>, vector<32x16xf32> -> vector<32x16xf32>
    %133 = vector.broadcast %48 : vector<1x16xf32> to vector<32x16xf32>
    %134 = arith.addf %132, %133 : vector<32x16xf32>
    %135 = arith.addf %124, %134 : vector<32x16xf32>
    %cst_47 = arith.constant dense<0.000000e+00> : vector<32xf32>
    %136 = vector.multi_reduction <add>, %135, %cst_47 [1] : vector<32x16xf32> to vector<32xf32>
    %137 = vector.shape_cast %136 : vector<32xf32> to vector<32x1xf32>
    %cst_48 = arith.constant 1.600000e+01 : f32
    %138 = vector.broadcast %cst_48 : f32 to vector<32x1xf32>
    %139 = arith.divf %137, %138 : vector<32x1xf32>
    %140 = vector.broadcast %139 : vector<32x1xf32> to vector<32x16xf32>
    %141 = arith.subf %135, %140 : vector<32x16xf32>
    %142 = arith.mulf %141, %141 : vector<32x16xf32>
    %cst_49 = arith.constant dense<0.000000e+00> : vector<32xf32>
    %143 = vector.multi_reduction <add>, %142, %cst_49 [1] : vector<32x16xf32> to vector<32xf32>
    %144 = vector.shape_cast %143 : vector<32xf32> to vector<32x1xf32>
    %cst_50 = arith.constant 1.600000e+01 : f32
    %145 = vector.broadcast %cst_50 : f32 to vector<32x1xf32>
    %146 = arith.divf %144, %145 : vector<32x1xf32>
    %cst_51 = arith.constant 9.99999974E-6 : f32
    %147 = vector.broadcast %cst_51 : f32 to vector<32x1xf32>
    %148 = arith.addf %146, %147 : vector<32x1xf32>
    %149 = math.rsqrt %148 : vector<32x1xf32>
    %150 = vector.broadcast %149 : vector<32x1xf32> to vector<32x16xf32>
    %151 = arith.mulf %141, %150 : vector<32x16xf32>
    %152 = vector.broadcast %51 : vector<1x16xf32> to vector<32x16xf32>
    %153 = arith.mulf %151, %152 : vector<32x16xf32>
    %154 = vector.broadcast %52 : vector<1x16xf32> to vector<32x16xf32>
    %155 = arith.addf %153, %154 : vector<32x16xf32>
    %c1 = arith.constant 1 : index
    %c0_52 = arith.constant 0 : index
    %c0_53 = arith.constant 0 : index
    %156 = vector.load %arg5[%c1, %c0_52, %c0_53] : memref<2x112x128xbf16, #tpu.memory_space<vmem>>, vector<1x16x16xbf16>
    %157 = vector.shape_cast %156 : vector<1x16x16xbf16> to vector<16x16xbf16>
    %c1_54 = arith.constant 1 : index
    %c16_55 = arith.constant 16 : index
    %c0_56 = arith.constant 0 : index
    %158 = vector.load %arg5[%c1_54, %c16_55, %c0_56] : memref<2x112x128xbf16, #tpu.memory_space<vmem>>, vector<1x16x16xbf16>
    %159 = vector.shape_cast %158 : vector<1x16x16xbf16> to vector<16x16xbf16>
    %c1_57 = arith.constant 1 : index
    %c32_58 = arith.constant 32 : index
    %c0_59 = arith.constant 0 : index
    %160 = vector.load %arg5[%c1_57, %c32_58, %c0_59] : memref<2x112x128xbf16, #tpu.memory_space<vmem>>, vector<1x16x16xbf16>
    %161 = vector.shape_cast %160 : vector<1x16x16xbf16> to vector<16x16xbf16>
    %c1_60 = arith.constant 1 : index
    %c48_61 = arith.constant 48 : index
    %c0_62 = arith.constant 0 : index
    %162 = vector.load %arg5[%c1_60, %c48_61, %c0_62] : memref<2x112x128xbf16, #tpu.memory_space<vmem>>, vector<1x16x16xbf16>
    %163 = vector.shape_cast %162 : vector<1x16x16xbf16> to vector<16x16xbf16>
    %c1_63 = arith.constant 1 : index
    %c64_64 = arith.constant 64 : index
    %c0_65 = arith.constant 0 : index
    %164 = vector.load %arg5[%c1_63, %c64_64, %c0_65] : memref<2x112x128xbf16, #tpu.memory_space<vmem>>, vector<1x16x32xbf16>
    %165 = vector.shape_cast %164 : vector<1x16x32xbf16> to vector<16x32xbf16>
    %c1_66 = arith.constant 1 : index
    %c80_67 = arith.constant 80 : index
    %c0_68 = arith.constant 0 : index
    %166 = vector.load %arg5[%c1_66, %c80_67, %c0_68] : memref<2x112x128xbf16, #tpu.memory_space<vmem>>, vector<1x32x16xbf16>
    %167 = vector.shape_cast %166 : vector<1x32x16xbf16> to vector<32x16xbf16>
    %c1_69 = arith.constant 1 : index
    %c0_70 = arith.constant 0 : index
    %c0_71 = arith.constant 0 : index
    %168 = vector.load %arg6[%c1_69, %c0_70, %c0_71] : memref<2x16x128xf32, #tpu.memory_space<vmem>>, vector<1x16x128xf32>
    %169 = vector.shape_cast %168 : vector<1x16x128xf32> to vector<16x128xf32>
    %170 = vector.extract_strided_slice %169 {offsets = [0, 0], sizes = [1, 16], strides = [1, 1]} : vector<16x128xf32> to vector<1x16xf32>
    %171 = vector.extract_strided_slice %169 {offsets = [1, 0], sizes = [1, 16], strides = [1, 1]} : vector<16x128xf32> to vector<1x16xf32>
    %172 = vector.extract_strided_slice %169 {offsets = [2, 0], sizes = [1, 16], strides = [1, 1]} : vector<16x128xf32> to vector<1x16xf32>
    %173 = vector.extract_strided_slice %169 {offsets = [3, 0], sizes = [1, 16], strides = [1, 1]} : vector<16x128xf32> to vector<1x16xf32>
    %174 = vector.extract_strided_slice %169 {offsets = [4, 0], sizes = [1, 32], strides = [1, 1]} : vector<16x128xf32> to vector<1x32xf32>
    %175 = vector.extract_strided_slice %169 {offsets = [5, 0], sizes = [1, 16], strides = [1, 1]} : vector<16x128xf32> to vector<1x16xf32>
    %176 = vector.extract_strided_slice %169 {offsets = [6, 0], sizes = [1, 16], strides = [1, 1]} : vector<16x128xf32> to vector<1x16xf32>
    %177 = vector.extract_strided_slice %169 {offsets = [7, 0], sizes = [1, 16], strides = [1, 1]} : vector<16x128xf32> to vector<1x16xf32>
    %178 = vector.extract_strided_slice %169 {offsets = [8, 0], sizes = [1, 16], strides = [1, 1]} : vector<16x128xf32> to vector<1x16xf32>
    %179 = vector.extract_strided_slice %169 {offsets = [9, 0], sizes = [1, 16], strides = [1, 1]} : vector<16x128xf32> to vector<1x16xf32>
    %180 = arith.truncf %155 : vector<32x16xf32> to vector<32x16xbf16>
    %cst_72 = arith.constant dense<0.000000e+00> : vector<32x16xf32>
    %181 = tpu.matmul %180, %157, %cst_72 {dimension_numbers = #tpu.dot_dimension_numbers<[1], [0], [0], [1], [0, 0, 1, 1], [], []>} : vector<32x16xbf16>, vector<16x16xbf16>, vector<32x16xf32> -> vector<32x16xf32>
    %182 = vector.broadcast %170 : vector<1x16xf32> to vector<32x16xf32>
    %183 = arith.addf %181, %182 : vector<32x16xf32>
    %cst_73 = arith.constant dense<0.000000e+00> : vector<32x16xf32>
    %184 = tpu.matmul %180, %159, %cst_73 {dimension_numbers = #tpu.dot_dimension_numbers<[1], [0], [0], [1], [0, 0, 1, 1], [], []>} : vector<32x16xbf16>, vector<16x16xbf16>, vector<32x16xf32> -> vector<32x16xf32>
    %185 = vector.broadcast %171 : vector<1x16xf32> to vector<32x16xf32>
    %186 = arith.addf %184, %185 : vector<32x16xf32>
    %cst_74 = arith.constant dense<0.000000e+00> : vector<32x16xf32>
    %187 = tpu.matmul %180, %161, %cst_74 {dimension_numbers = #tpu.dot_dimension_numbers<[1], [0], [0], [1], [0, 0, 1, 1], [], []>} : vector<32x16xbf16>, vector<16x16xbf16>, vector<32x16xf32> -> vector<32x16xf32>
    %188 = vector.broadcast %172 : vector<1x16xf32> to vector<32x16xf32>
    %189 = arith.addf %187, %188 : vector<32x16xf32>
    %190 = vector.broadcast %7 : vector<1x16xf32> to vector<32x16xf32>
    %191 = arith.mulf %183, %190 : vector<32x16xf32>
    %cst_75 = arith.constant 0.353553385 : f32
    %192 = vector.broadcast %cst_75 : f32 to vector<32x16xf32>
    %193 = arith.mulf %191, %192 : vector<32x16xf32>
    %cst_76 = arith.constant dense<0.000000e+00> : vector<32x32xf32>
    %194 = tpu.matmul %193, %186, %cst_76 {dimension_numbers = #tpu.dot_dimension_numbers<[1], [1], [0], [0], [0, 0, 1, 0], [], []>} : vector<32x16xf32>, vector<32x16xf32>, vector<32x32xf32> -> vector<32x32xf32>
    %195 = arith.addf %194, %28 : vector<32x32xf32>
    %cst_77 = arith.constant dense<0xFF800000> : vector<32xf32>
    %196 = vector.multi_reduction <maximumf>, %195, %cst_77 [1] : vector<32x32xf32> to vector<32xf32>
    %197 = vector.shape_cast %196 : vector<32xf32> to vector<32x1xf32>
    %198 = vector.broadcast %197 : vector<32x1xf32> to vector<32x32xf32>
    %199 = arith.subf %195, %198 : vector<32x32xf32>
    %200 = math.exp %199 : vector<32x32xf32>
    %cst_78 = arith.constant dense<0.000000e+00> : vector<32xf32>
    %201 = vector.multi_reduction <add>, %200, %cst_78 [1] : vector<32x32xf32> to vector<32xf32>
    %202 = vector.shape_cast %201 : vector<32xf32> to vector<32x1xf32>
    %203 = vector.broadcast %202 : vector<32x1xf32> to vector<32x32xf32>
    %204 = arith.divf %200, %203 : vector<32x32xf32>
    %205 = vector.broadcast %7 : vector<1x16xf32> to vector<32x16xf32>
    %206 = arith.mulf %189, %205 : vector<32x16xf32>
    %cst_79 = arith.constant dense<0.000000e+00> : vector<32x16xf32>
    %207 = tpu.matmul %204, %206, %cst_79 {dimension_numbers = #tpu.dot_dimension_numbers<[1], [0], [0], [1], [0, 0, 1, 1], [], []>} : vector<32x32xf32>, vector<32x16xf32>, vector<32x16xf32> -> vector<32x16xf32>
    %208 = vector.broadcast %14 : vector<1x16xf32> to vector<32x16xf32>
    %209 = arith.mulf %183, %208 : vector<32x16xf32>
    %cst_80 = arith.constant 0.353553385 : f32
    %210 = vector.broadcast %cst_80 : f32 to vector<32x16xf32>
    %211 = arith.mulf %209, %210 : vector<32x16xf32>
    %cst_81 = arith.constant dense<0.000000e+00> : vector<32x32xf32>
    %212 = tpu.matmul %211, %186, %cst_81 {dimension_numbers = #tpu.dot_dimension_numbers<[1], [1], [0], [0], [0, 0, 1, 0], [], []>} : vector<32x16xf32>, vector<32x16xf32>, vector<32x32xf32> -> vector<32x32xf32>
    %213 = arith.addf %212, %28 : vector<32x32xf32>
    %cst_82 = arith.constant dense<0xFF800000> : vector<32xf32>
    %214 = vector.multi_reduction <maximumf>, %213, %cst_82 [1] : vector<32x32xf32> to vector<32xf32>
    %215 = vector.shape_cast %214 : vector<32xf32> to vector<32x1xf32>
    %216 = vector.broadcast %215 : vector<32x1xf32> to vector<32x32xf32>
    %217 = arith.subf %213, %216 : vector<32x32xf32>
    %218 = math.exp %217 : vector<32x32xf32>
    %cst_83 = arith.constant dense<0.000000e+00> : vector<32xf32>
    %219 = vector.multi_reduction <add>, %218, %cst_83 [1] : vector<32x32xf32> to vector<32xf32>
    %220 = vector.shape_cast %219 : vector<32xf32> to vector<32x1xf32>
    %221 = vector.broadcast %220 : vector<32x1xf32> to vector<32x32xf32>
    %222 = arith.divf %218, %221 : vector<32x32xf32>
    %223 = vector.broadcast %14 : vector<1x16xf32> to vector<32x16xf32>
    %224 = arith.mulf %189, %223 : vector<32x16xf32>
    %cst_84 = arith.constant dense<0.000000e+00> : vector<32x16xf32>
    %225 = tpu.matmul %222, %224, %cst_84 {dimension_numbers = #tpu.dot_dimension_numbers<[1], [0], [0], [1], [0, 0, 1, 1], [], []>} : vector<32x32xf32>, vector<32x16xf32>, vector<32x16xf32> -> vector<32x16xf32>
    %226 = arith.addf %207, %225 : vector<32x16xf32>
    %227 = arith.truncf %226 : vector<32x16xf32> to vector<32x16xbf16>
    %cst_85 = arith.constant dense<0.000000e+00> : vector<32x16xf32>
    %228 = tpu.matmul %227, %163, %cst_85 {dimension_numbers = #tpu.dot_dimension_numbers<[1], [0], [0], [1], [0, 0, 1, 1], [], []>} : vector<32x16xbf16>, vector<16x16xbf16>, vector<32x16xf32> -> vector<32x16xf32>
    %229 = vector.broadcast %173 : vector<1x16xf32> to vector<32x16xf32>
    %230 = arith.addf %228, %229 : vector<32x16xf32>
    %231 = arith.addf %155, %230 : vector<32x16xf32>
    %cst_86 = arith.constant dense<0.000000e+00> : vector<32xf32>
    %232 = vector.multi_reduction <add>, %231, %cst_86 [1] : vector<32x16xf32> to vector<32xf32>
    %233 = vector.shape_cast %232 : vector<32xf32> to vector<32x1xf32>
    %cst_87 = arith.constant 1.600000e+01 : f32
    %234 = vector.broadcast %cst_87 : f32 to vector<32x1xf32>
    %235 = arith.divf %233, %234 : vector<32x1xf32>
    %236 = vector.broadcast %235 : vector<32x1xf32> to vector<32x16xf32>
    %237 = arith.subf %231, %236 : vector<32x16xf32>
    %238 = arith.mulf %237, %237 : vector<32x16xf32>
    %cst_88 = arith.constant dense<0.000000e+00> : vector<32xf32>
    %239 = vector.multi_reduction <add>, %238, %cst_88 [1] : vector<32x16xf32> to vector<32xf32>
    %240 = vector.shape_cast %239 : vector<32xf32> to vector<32x1xf32>
    %cst_89 = arith.constant 1.600000e+01 : f32
    %241 = vector.broadcast %cst_89 : f32 to vector<32x1xf32>
    %242 = arith.divf %240, %241 : vector<32x1xf32>
    %cst_90 = arith.constant 9.99999974E-6 : f32
    %243 = vector.broadcast %cst_90 : f32 to vector<32x1xf32>
    %244 = arith.addf %242, %243 : vector<32x1xf32>
    %245 = math.rsqrt %244 : vector<32x1xf32>
    %246 = vector.broadcast %245 : vector<32x1xf32> to vector<32x16xf32>
    %247 = arith.mulf %237, %246 : vector<32x16xf32>
    %248 = vector.broadcast %176 : vector<1x16xf32> to vector<32x16xf32>
    %249 = arith.mulf %247, %248 : vector<32x16xf32>
    %250 = vector.broadcast %177 : vector<1x16xf32> to vector<32x16xf32>
    %251 = arith.addf %249, %250 : vector<32x16xf32>
    %252 = arith.truncf %251 : vector<32x16xf32> to vector<32x16xbf16>
    %cst_91 = arith.constant dense<0.000000e+00> : vector<32x32xf32>
    %253 = tpu.matmul %252, %165, %cst_91 {dimension_numbers = #tpu.dot_dimension_numbers<[1], [0], [0], [1], [0, 0, 1, 1], [], []>} : vector<32x16xbf16>, vector<16x32xbf16>, vector<32x32xf32> -> vector<32x32xf32>
    %254 = vector.broadcast %174 : vector<1x32xf32> to vector<32x32xf32>
    %255 = arith.addf %253, %254 : vector<32x32xf32>
    %cst_92 = arith.constant 0.000000e+00 : f32
    %256 = vector.broadcast %cst_92 : f32 to vector<32x32xf32>
    %257 = arith.maximumf %255, %256 : vector<32x32xf32>
    %258 = arith.truncf %257 : vector<32x32xf32> to vector<32x32xbf16>
    %cst_93 = arith.constant dense<0.000000e+00> : vector<32x16xf32>
    %259 = tpu.matmul %258, %167, %cst_93 {dimension_numbers = #tpu.dot_dimension_numbers<[1], [0], [0], [1], [0, 0, 1, 1], [], []>} : vector<32x32xbf16>, vector<32x16xbf16>, vector<32x16xf32> -> vector<32x16xf32>
    %260 = vector.broadcast %175 : vector<1x16xf32> to vector<32x16xf32>
    %261 = arith.addf %259, %260 : vector<32x16xf32>
    %262 = arith.addf %251, %261 : vector<32x16xf32>
    %cst_94 = arith.constant dense<0.000000e+00> : vector<32xf32>
    %263 = vector.multi_reduction <add>, %262, %cst_94 [1] : vector<32x16xf32> to vector<32xf32>
    %264 = vector.shape_cast %263 : vector<32xf32> to vector<32x1xf32>
    %cst_95 = arith.constant 1.600000e+01 : f32
    %265 = vector.broadcast %cst_95 : f32 to vector<32x1xf32>
    %266 = arith.divf %264, %265 : vector<32x1xf32>
    %267 = vector.broadcast %266 : vector<32x1xf32> to vector<32x16xf32>
    %268 = arith.subf %262, %267 : vector<32x16xf32>
    %269 = arith.mulf %268, %268 : vector<32x16xf32>
    %cst_96 = arith.constant dense<0.000000e+00> : vector<32xf32>
    %270 = vector.multi_reduction <add>, %269, %cst_96 [1] : vector<32x16xf32> to vector<32xf32>
    %271 = vector.shape_cast %270 : vector<32xf32> to vector<32x1xf32>
    %cst_97 = arith.constant 1.600000e+01 : f32
    %272 = vector.broadcast %cst_97 : f32 to vector<32x1xf32>
    %273 = arith.divf %271, %272 : vector<32x1xf32>
    %cst_98 = arith.constant 9.99999974E-6 : f32
    %274 = vector.broadcast %cst_98 : f32 to vector<32x1xf32>
    %275 = arith.addf %273, %274 : vector<32x1xf32>
    %276 = math.rsqrt %275 : vector<32x1xf32>
    %277 = vector.broadcast %276 : vector<32x1xf32> to vector<32x16xf32>
    %278 = arith.mulf %268, %277 : vector<32x16xf32>
    %279 = vector.broadcast %178 : vector<1x16xf32> to vector<32x16xf32>
    %280 = arith.mulf %278, %279 : vector<32x16xf32>
    %281 = vector.broadcast %179 : vector<1x16xf32> to vector<32x16xf32>
    %282 = arith.addf %280, %281 : vector<32x16xf32>
    %283 = arith.truncf %282 : vector<32x16xf32> to vector<32x16xbf16>
    %c0_99 = arith.constant 0 : index
    %c0_100 = arith.constant 0 : index
    %284 = vector.load %arg7[%c0_99, %c0_100] : memref<16x128xbf16, #tpu.memory_space<vmem>>, vector<16x128xbf16>
    %cst_101 = arith.constant dense<0.000000e+00> : vector<32x128xf32>
    %285 = tpu.matmul %283, %284, %cst_101 {dimension_numbers = #tpu.dot_dimension_numbers<[1], [0], [0], [1], [0, 0, 1, 1], [], []>} : vector<32x16xbf16>, vector<16x128xbf16>, vector<32x128xf32> -> vector<32x128xf32>
    %c0_102 = arith.constant 0 : index
    %c0_103 = arith.constant 0 : index
    %286 = vector.load %arg8[%c0_102, %c0_103] : memref<1x128xf32, #tpu.memory_space<vmem>>, vector<1x128xf32>
    %287 = vector.broadcast %286 : vector<1x128xf32> to vector<32x128xf32>
    %288 = arith.addf %285, %287 : vector<32x128xf32>
    %c0_104 = arith.constant 0 : index
    %c0_105 = arith.constant 0 : index
    %289 = vector.load %arg9[%c0_104, %c0_105] : memref<32x128xf32, #tpu.memory_space<vmem>>, vector<32x128xf32>
    tpu.vector_store %arg9[%c0_104, %c0_105], %288 {strides = array<i32>} : memref<32x128xf32, #tpu.memory_space<vmem>>, vector<32x128xf32>,
    return
  }
  func.func @transform_0(%arg0: i32) -> (i32, i32) {
    %c0_i32 = arith.constant 0 : i32
    %c0_i32_0 = arith.constant 0 : i32
    return %arg0, %c0_i32 : i32, i32
  }
  func.func @transform_1(%arg0: i32) -> (i32, i32) {
    %c0_i32 = arith.constant 0 : i32
    %c0_i32_0 = arith.constant 0 : i32
    return %arg0, %c0_i32 : i32, i32
  }
  func.func @transform_2(%arg0: i32) -> (i32, i32) {
    %c0_i32 = arith.constant 0 : i32
    %c0_i32_0 = arith.constant 0 : i32
    %c0_i32_1 = arith.constant 0 : i32
    return %c0_i32, %c0_i32_0 : i32, i32
  }
  func.func @transform_3(%arg0: i32) -> (i32, i32) {
    %c0_i32 = arith.constant 0 : i32
    %c0_i32_0 = arith.constant 0 : i32
    %c0_i32_1 = arith.constant 0 : i32
    return %c0_i32, %c0_i32_0 : i32, i32
  }
  func.func @transform_4(%arg0: i32) -> (i32, i32, i32) {
    %c0_i32 = arith.constant 0 : i32
    %c0_i32_0 = arith.constant 0 : i32
    %c0_i32_1 = arith.constant 0 : i32
    %c0_i32_2 = arith.constant 0 : i32
    return %c0_i32, %c0_i32_0, %c0_i32_1 : i32, i32, i32
  }
  func.func @transform_5(%arg0: i32) -> (i32, i32, i32) {
    %c0_i32 = arith.constant 0 : i32
    %c0_i32_0 = arith.constant 0 : i32
    %c0_i32_1 = arith.constant 0 : i32
    %c0_i32_2 = arith.constant 0 : i32
    return %c0_i32, %c0_i32_0, %c0_i32_1 : i32, i32, i32
  }
  func.func @transform_6(%arg0: i32) -> (i32, i32) {
    %c0_i32 = arith.constant 0 : i32
    %c0_i32_0 = arith.constant 0 : i32
    %c0_i32_1 = arith.constant 0 : i32
    return %c0_i32, %c0_i32_0 : i32, i32
  }
  func.func @transform_7(%arg0: i32) -> (i32, i32) {
    %c0_i32 = arith.constant 0 : i32
    %c0_i32_0 = arith.constant 0 : i32
    %c0_i32_1 = arith.constant 0 : i32
    return %c0_i32, %c0_i32_0 : i32, i32
  }
  func.func @transform_8(%arg0: i32) -> (i32, i32) {
    %c0_i32 = arith.constant 0 : i32
    %c0_i32_0 = arith.constant 0 : i32
    return %arg0, %c0_i32 : i32, i32
  }
}

</mosaic_0001>

<bundles_post_ra>
// kernel: tpu_custom_call.1
= control target key start
LH: loop header
LB: loop body
LE: loop exit
PB: predicated region body
PF: predicated region fallthrough
CT: control target
= control target key end

     0   :  { %13 = vsyncpa [#allocation3], 0  ;;  %s3383_s0 = inlined_call_operand.vmem [shape: s32[64,1], index: 0, kind: input, shape index: {}]   ;;  %s3384_s1 = inlined_call_operand.vmem [shape: f32[64,16], index: 1, kind: input, shape index: {}]   ;;  %s3385_s2 = inlined_call_operand.vmem [shape: f32[32,32], index: 2, kind: input, shape index: {}]   ;;  %s3386_s3 = inlined_call_operand.vmem [shape: bf16[32,16], index: 3, kind: input, shape index: {}]   ;;  %s3387_s4 = inlined_call_operand.vmem [shape: bf16[2,112,128], index: 4, kind: input, shape index: {}]   ;;  %s3388_s5 = inlined_call_operand.hbm [shape: f32[2,16,128], index: 5, kind: input, shape index: {}]   ;;  %s3389_s6 = inlined_call_operand.vmem [shape: bf16[16,128], index: 6, kind: input, shape index: {}]   ;;  %s3390_s7 = inlined_call_operand.vmem [shape: f32[1,128], index: 7, kind: input, shape index: {}]   ;;  %s3391_s8 = inlined_call_operand.hbm [shape: f32[64,128], index: 8, kind: output, shape index: {}]  }
   0x1   :  { %14 = vsyncpa [#allocation4], 0 }
   0x2   :  { %16 = vsyncpa [#allocation4 + $0x1], 0  ;;  %s2735_s27 = smov 0   ;;  %s2737_s28 = smov 0  }
   0x3   :  { %s2739_s29 = smov 0   ;;  %s2741_s30 = smov 0  }
   0x4 LB: > { %s2756_s9 = sadd.s32 4294967295, %s2680_s30   ;;  %s2222_s10 = sadd.s32 4294967294, %s2680_s30   ;;  %s2680_s30 = sphi %s2741_s30, %s3401_s30   ;;  %s2676_s29 = sphi %s2739_s29, %s3400_s29   ;;  %s2672_s28 = sphi %s2737_s28, %s3399_s28   ;;  %s2668_s27 = sphi %s2735_s27, %s3398_s27  }
   0x5   : > { %s2760_s11 = sadd.s32 1, %s2680_s30   ;;  %s207_s12 = sadd.s32 1, %s2676_s29 }
   0x6   : > { %s204_s13 = ssub.s32 %s2680_s30, %s2760_s11  ;;  %p217_p0 = scmp.ne.s32.totalorder %s2676_s29, %s2672_s28 }
   0x7   : > { %p205_p1 = scmp.eq.s32.totalorder %s204_s13, 0  ;;  %p218_p2 = scmp.eq.s32.totalorder %s2756_s9, 1 }
   0x8   : > { %p223_p3 = scmp.ne.s32.totalorder %s2672_s28, %s2668_s27  ;;  %p224_p4 = scmp.eq.s32.totalorder %s2222_s10, 1 }
   0x9   : > { %s2771_s14 = scalar_select %p205_p1, %s2676_s29, %s207_s12  }
   0xa   : > { %p2773_p5 = por %p218_p2, %p217_p0  ;;  %p2777_p6 = por %p224_p4, %p223_p3 }
   0xb   : > { %p2223_p7 = scmp.ge.s32.totalorder %s2680_s30, 1  ;;  %p231_p8 = scmp.lt.s32.totalorder %s2680_s30, 3 }
   0xc   : > { %p2436_p9 = scmp.eq.s32.totalorder %s2756_s9, 0  ;;  %s251_s19 = sshll.u32 %s3388_s5, 4  ;;  %s252_s19 = int_to_ptr.hbm [resolvable:$true] %s251_s19 }
   0xd   : > { %p232_p10 = pnand %p2223_p7, %p231_p8  ;;  %s2682_s20 = smov [#allocation2]  }
   0xe   : > { %s253_s21 = sshll.u32 %s2682_s20, 4  ;;  %s2683_s22 = smov 128   ;;  %s254_s21 = int_to_ptr.vmem [resolvable:$true] %s253_s21 }
   0xf   : > { %p2428_p11 = pneg %p232_p10  ;;  %s2684_s23 = smov 8  }
  0x10   : > { %293 = sbr.rel (%p232_p10) target bundleno = 3819 (0xeeb), region = 52 }
  0x11   : > { %p2429_p12 = pnand %p2436_p9, %p2428_p11 }
  0x13   : > { %2431 = dma.hbm_to_vmem [thread:$0]  (!%p2429_p12), %s252_s19, 512, %s254_s21, [#allocation3], %s2683_s22, %s2683_s22, %s2684_s23  }
  0x15   : > { %2659 = dma.done.wait (%p2436_p9), [#allocation3], 512  }
  0x16   : > { %2661 = vsyncadd (%p2436_p9), [#allocation3], 4294966784  ;;  %s2229_s24 = sshll.u32 %s2756_s9, 2  ;;  %v2685_v0 = vmov 0   ;;  %v2403_v5 = vld [vmem:[%s3386_s3 + $0x8] sm:$0xff]  ;;  %v2402_v6 = vld [vmem:[%s3386_s3] sm:$0xff]  ;;  %v347_v7 = vlaneseq }
  0x17   : > { %2479 = vset.pattern.permute.xlu0 %v2685_v0  ;;  %p334_p13 = scmp.lt.s32.totalorder %s2229_s24, 7  ;;  %2480 = vset.pattern.permute.xlu1 %v2685_v0  ;;  %v2686_v12 = vmov 0.0   ;;  %vm405_vm2 = vcmask 261120   ;;  %v2404_v20 = vld [vmem:[%s3387_s4] sm:$0xff]  ;;  %v2405_v21 = vld [vmem:[%s3387_s4 + $0x8] sm:$0xff]  ;;  %v2406_v22 = vld [vmem:[%s3387_s4 + $0x10] sm:$0xff] }
  0x18   : > { %418 = vmatpush.bf16.msra.mxu0 %v2403_v5  ;;  %v2808_v9 = vand.u32 127, %v347_v7  ;;  %486 = vmatpush.bf16.msra.mxu1 %v2404_v20  ;;  %vm472_vm5 = vcmask 130048   ;;  %v2852_v43 = vld [vmem:[#allocation2] sm:$0xff]  ;;  %s2419_s22 = sshll.u32 %s2756_s9, 5  ;;  %s2634_s20 = scalar_lea.hbm %s3391_s8, 64 }
  0x19   : > { %s3403_s24 = smov (!%p334_p13, %s2229_s24), 7  ;;  %2420 = vmatpush.bf16.msra.mxu3 %v2404_v20  ;;  %2421 = vmatpush.bf16.msra.mxu2 %v2405_v21  ;;  %v498_v45 = vperm.slane %v2852_v43, 1  ;;  %v465_v50 = vperm.slane %v2852_v43, 0  ;;  %s2132_s10 = scalar_lea.hbm %s3391_s8, %s2419_s22 }
  0x1a   : > { %s2230_s25 = sshll.u32 %s3403_s24, 3  ;;  %vm354_vm6 = vcmp.ge.s32.totalorder %v2808_v9, 8  ;;  %vm355_vm7 = vcmp.lt.s32.totalorder %v2808_v9, 16  ;;  %vm350_vm8 = vcmp.lt.s32.totalorder %v2808_v9, 8  ;;  %s2135_s13 = sshll.u32 %s2132_s10, 4  ;;  %s2136_s13 = int_to_ptr.hbm [resolvable:$true] %s2135_s13 }
  0x1b   : > { %s337_s12 = scalar_lea.vmem %s3383_s0, %s2230_s25  ;;  %s343_s17 = scalar_lea.vmem %s3384_s1, %s2230_s25  ;;  %vm356_vm9 = vmand %vm354_vm6, %vm355_vm7  ;;  %v2864_v55 = vsel %vm350_vm8, 1.0, %v2686_v12 }
  0x1c   : > { %v359_v1 = vld [vmem:[%s337_s12] sm:$0xff]  ;;  %v361_v2 = vld [vmem:[%s337_s12 + $0x10] sm:$0xff]  ;;  %v360_v3 = vld [vmem:[%s337_s12 + $0x8] sm:$0xff]  ;;  %419 = vmatpush.bf16.msra.mxu0 %v2402_v6  ;;  %v2867_v56 = vsel %vm356_vm9, 1.0, %v2686_v12  ;;  %s330_s25 = sand.u32 1, %s2672_s28   ;;  %s2628_s24 = sshra.s32 %s2136_s13, 4  ;;  %s2629_s24 = int_to_ptr.hbm [resolvable:$true] %s2628_s24 }
  0x1d   : > { %364 = vperm.xlu0 %2479, %v359_v1   ;;  %370 = vperm.xlu1 %2480, %v361_v2   ;;  %v362_v4 = vld [vmem:[%s337_s12 + $0x18] sm:$0xff]  ;;  %v435_v25 = vld [vmem:[%s343_s17] sm:$0xff]  ;;  %v436_v27 = vld [vmem:[%s343_s17 + $0x8] sm:$0xff]  ;;  %s2228_s18 = sshll.u32 %s330_s25, 5  ;;  %p2635_p3 = scmp.lt.s32.totalorder %s2629_s24, %s3391_s8 }
  0x1e   : > { %538 = vmatpush.bf16.msrb.mxu3 %v2406_v22  ;;  %v437_v34 = vld [vmem:[%s343_s17 + $0x10] sm:$0xff]  ;;  %v438_v36 = vld [vmem:[%s343_s17 + $0x18] sm:$0xff]  ;;  %s332_s21 = scalar_lea.vmem [#allocation5], %s2228_s18  ;;  %s2121_s17 = scalar_lea.sflag [#allocation4], %s330_s25 }
  0x1f   : > { %s2133_s12 = sshll.u32 %s332_s21, 4  ;;  %s2630_s18 = scalar_lea.hbm %s2629_s24, 32  ;;  %s2134_s12 = int_to_ptr.vmem [resolvable:$true] %s2133_s12 }
  0x20   : > { %512 = vmatpush.bf16.msrb.mxu0 %v2405_v21  ;;  %p2631_p0 = scmp.ne.s32.totalorder %s2629_s24, %s2630_s18  ;;  %p2636_p4 = scmp.lt.s32.totalorder %s2634_s20, %s2630_s18 }
  0x22   : > { %p2632_p1 = pnand %p2631_p0, %p2773_p5  ;;  %p2637_p7 = por %p2636_p4, %p2635_p3 }
  0x24   : > { %p2633_p2 = pneg %p2632_p1 }
  0x25   : > { %367 = vperm.xlu0 %2479, %v360_v3   ;;  %373 = vperm.xlu1 %2480, %v362_v4  }
  0x26   : > { %p2638_p8 = pnand %p2637_p7, %p2633_p2 }
  0x8f   : > { %v365_v8 = vpop.permute.xlu0 %364  ;;  %v371_v10 = vpop.permute.xlu1 %370 }
  0x90   : > { %vm375_vm0 = vcmp.eq.s32.totalorder %v2808_v9, %v365_v8  ;;  %vm377_vm3 = vcmp.eq.s32.totalorder %v2808_v9, %v371_v10  ;;  %v524_v10 = vperm.slane %v2852_v43, 2 }
  0x91   : > { %v2235_v13 = vsel %vm375_vm0, 1.0, %v2686_v12  ;;  %v2237_v17 = vsel %vm377_vm3, 1.0, %v2686_v12 }
  0x97   : > { %v368_v11 = vpop.permute.xlu0 %367  ;;  %v374_v16 = vpop.permute.xlu1 %373 }
  0x98   : > { %vm376_vm1 = vcmp.eq.s32.totalorder %v2808_v9, %v368_v11  ;;  %vm378_vm4 = vcmp.eq.s32.totalorder %v2808_v9, %v374_v16 }
  0x99   : > { %v2236_v14 = vsel %vm376_vm1, 1.0, %v2686_v12  ;;  %v2238_v18 = vsel %vm378_vm4, 1.0, %v2686_v12 }
  0x9a   : > { %v387_v15 = vpack.c.bf16 %v2236_v14, %v2235_v13  ;;  %v388_v19 = vpack.c.bf16 %v2238_v18, %v2237_v17 }
  0x9c   : > { %2247 = vmatmul.msk.bf16.vlgmr.msra.gmra.mxu0 %vm405_vm2, %v387_v15 }
  0xac   : > { %2248 = vmatmul.msk.bf16.gmra.mxu0 %vm405_vm2, %v388_v19 }
 0x119   : > { %v421_v23 = vpop.f32.mrf.mxu0 }
 0x11a   : > { %v431_v24 = vmul.f32 4.0, %v421_v23 }
 0x11c   : > { %v2834_v29 = vadd.f32 %v435_v25, %v431_v24 }
 0x121   : > { %v423_v26 = vpop.f32.mrf.mxu0 }
 0x122   : > { %v432_v28 = vmul.f32 4.0, %v423_v26 }
 0x124   : > { %v2836_v30 = vadd.f32 %v436_v27, %v432_v28 }
 0x126   : > { %v463_v31 = vpack.c.bf16 %v2836_v30, %v2834_v29 }
 0x128   : > { %2253 = vmatmul.msk.bf16.vlgmr.msra.gmra.mxu1 %vm472_vm5, %v463_v31  ;;  %2259 = vmatmul.msk.bf16.vlgmr.msrb.gmra.mxu0 %vm472_vm5, %v463_v31 }
 0x129   : > { %v426_v32 = vpop.f32.mrf.mxu0 }
 0x12a   : > { %v433_v33 = vmul.f32 4.0, %v426_v32 }
 0x12c   : > { %v2842_v38 = vadd.f32 %v437_v34, %v433_v33  ;;  %v443_v33 = vld [vmem:[%s3385_s2] sm:$0xff] }
 0x131   : > { %v428_v35 = vpop.f32.mrf.mxu0 }
 0x132   : > { %v434_v37 = vmul.f32 4.0, %v428_v35 }
 0x134   : > { %v2844_v39 = vadd.f32 %v438_v36, %v434_v37 }
 0x136   : > { %v464_v40 = vpack.c.bf16 %v2844_v39, %v2842_v38 }
 0x138   : > { %2254 = vmatmul.msk.bf16.vlgmr.msra.gmra.mxu3 %vm472_vm5, %v464_v40  ;;  %2260 = vmatmul.msk.bf16.vlgmr.msra.gmra.mxu2 %vm472_vm5, %v464_v40 }
 0x148   : > { %2265 = vmatmul.msk.bf16.vlgmr.msrb.gmra.mxu3 %vm472_vm5, %v463_v31 }
 0x158   : > { %2266 = vmatmul.msk.bf16.gmra.mxu3 %vm472_vm5, %v464_v40  ;;  %v444_v40 = vld [vmem:[%s3385_s2 + $0x8] sm:$0xff] }
 0x1a5   : > { %v514_v44 = vpop.f32.mrf.mxu0  ;;  %v488_v49 = vpop.f32.mrf.mxu1 }
 0x1a6   : > { %v489_v53 = vadd.f32 %v488_v49, %v465_v50  ;;  %v515_v60 = vadd.f32 %v514_v44, %v498_v45 }
 0x1a8   : > { %v550_v58 = vmul.f32 %v2864_v55, %v489_v53  ;;  %v711_v59 = vmul.f32 %v2867_v56, %v489_v53 }
 0x1aa   : > { %v554_v62 = vmul.f32 0.35355338, %v550_v58  ;;  %v715_v63 = vmul.f32 0.35355338, %v711_v59  ;;  %v446_v59 = vld [vmem:[%s3385_s2 + $0x18] sm:$0xff] }
 0x1ad   : > { %v516_v52 = vpop.f32.mrf.mxu0  ;;  %v490_v61 = vpop.f32.mrf.mxu1 }
 0x1ae   : > { %v517_v57 = vadd.f32 %v516_v52, %v498_v45  ;;  %v491_v0 = vadd.f32 %v490_v61, %v465_v50 }
 0x1b0   : > { %v551_v2 = vmul.f32 %v2864_v55, %v491_v0  ;;  %v712_v3 = vmul.f32 %v2867_v56, %v491_v0 }
 0x1b2   : > { %v555_v4 = vmul.f32 0.35355338, %v551_v2  ;;  %v716_v5 = vmul.f32 0.35355338, %v712_v3 }
 0x1bb   : > { %v493_v41 = vpop.f32.mrf.mxu3  ;;  %v519_v42 = vpop.f32.mrf.mxu2 }
 0x1bc   : > { %v520_v51 = vadd.f32 %v519_v42, %v498_v45  ;;  %v494_v6 = vadd.f32 %v493_v41, %v465_v50 }
 0x1be   : > { %v552_v8 = vmul.f32 %v2864_v55, %v494_v6  ;;  %v713_v9 = vmul.f32 %v2867_v56, %v494_v6 }
 0x1c0   : > { %v556_v11 = vmul.f32 0.35355338, %v552_v8  ;;  %v717_v12 = vmul.f32 0.35355338, %v713_v9 }
 0x1c3   : > { %v495_v46 = vpop.f32.mrf.mxu3  ;;  %v521_v47 = vpop.f32.mrf.mxu2 }
 0x1c4   : > { %v522_v48 = vadd.f32 %v521_v47, %v498_v45  ;;  %v496_v13 = vadd.f32 %v495_v46, %v465_v50 }
 0x1c6   : > { %2267 = vmatpush.xpose.msk.msrb.mxu1 %vm472_vm5, %v522_v48  ;;  %2275 = vmatpush.xpose.msk.msrb.mxu2 %vm472_vm5, %v522_v48  ;;  %v553_v20 = vmul.f32 %v2864_v55, %v496_v13  ;;  %v714_v21 = vmul.f32 %v2867_v56, %v496_v13  ;;  %v445_v48 = vld [vmem:[%s3385_s2 + $0x10] sm:$0xff] }
 0x1c8   : > { %v557_v27 = vmul.f32 0.35355338, %v553_v20  ;;  %v718_v28 = vmul.f32 0.35355338, %v714_v21 }
 0x1ca   : > { %2268 = vmatpush.xpose.msk.msrb.mxu1 %vm472_vm5, %v520_v51  ;;  %2276 = vmatpush.xpose.msk.msrb.mxu2 %vm472_vm5, %v520_v51 }
 0x1cb   : > { %v540_v54 = vpop.f32.mrf.mxu3 }
 0x1cc   : > { %v541_v22 = vadd.f32 %v540_v54, %v524_v10 }
 0x1ce   : > { %2269 = vmatpush.xpose.msk.msrb.mxu1 %vm472_vm5, %v517_v57  ;;  %2277 = vmatpush.xpose.msk.msrb.mxu2 %vm472_vm5, %v517_v57  ;;  %v707_v31 = vmul.f32 %v2864_v55, %v541_v22  ;;  %v856_v32 = vmul.f32 %v2867_v56, %v541_v22 }
 0x1d2   : > { %2270 = vmatpush.xpose.msk.msrb.mxu1 %vm472_vm5, %v515_v60  ;;  %2278 = vmatpush.xpose.msk.msrb.mxu2 %vm472_vm5, %v515_v60 }
 0x1d3   : > { %v542_v1 = vpop.f32.mrf.mxu3 }
 0x1d4   : > { %v543_v17 = vadd.f32 %v542_v1, %v524_v10 }
 0x1d5   : > { %2271 = vmatmul.msk.f32.vlgmr.msrb.gmra.mxu1 %vm472_vm5, %v554_v62  ;;  %2279 = vmatmul.msk.f32.vlgmr.msrb.gmra.mxu2 %vm472_vm5, %v715_v63 }
 0x1d6   : > { %v708_v25 = vmul.f32 %v2864_v55, %v543_v17  ;;  %v857_v26 = vmul.f32 %v2867_v56, %v543_v17 }
 0x1db   : > { %v545_v7 = vpop.f32.mrf.mxu3 }
 0x1dc   : > { %v546_v15 = vadd.f32 %v545_v7, %v524_v10 }
 0x1dd   : > { %2272 = vmatmul.msk.f32.gmra.mxu1 %vm472_vm5, %v555_v4  ;;  %2280 = vmatmul.msk.f32.gmra.mxu2 %vm472_vm5, %v716_v5 }
 0x1de   : > { %v709_v23 = vmul.f32 %v2864_v55, %v546_v15  ;;  %v858_v24 = vmul.f32 %v2867_v56, %v546_v15 }
 0x1e3   : > { %v547_v14 = vpop.f32.mrf.mxu3 }
 0x1e4   : > { %v548_v16 = vadd.f32 %v547_v14, %v524_v10 }
 0x1e5   : > { %2273 = vmatmul.msk.f32.gmra.mxu1 %vm472_vm5, %v556_v11  ;;  %2281 = vmatmul.msk.f32.gmra.mxu2 %vm472_vm5, %v717_v12 }
 0x1e6   : > { %v710_v18 = vmul.f32 %v2864_v55, %v548_v16  ;;  %v859_v19 = vmul.f32 %v2867_v56, %v548_v16 }
 0x1e8   : > { %884 = vmatpush.msra.mxu3 %v859_v19  ;;  %925 = vmatpush.msra.mxu0 %v710_v18 }
 0x1ea   : > { %885 = vmatpush.msra.mxu3 %v858_v24  ;;  %926 = vmatpush.msra.mxu0 %v709_v23 }
 0x1ec   : > { %886 = vmatpush.msra.mxu3 %v857_v26  ;;  %927 = vmatpush.msra.mxu0 %v708_v25 }
 0x1ed   : > { %2274 = vmatmul.msk.f32.gmra.mxu1 %vm472_vm5, %v557_v27  ;;  %2282 = vmatmul.msk.f32.gmra.mxu2 %vm472_vm5, %v718_v28 }
 0x1ee   : > { %887 = vmatpush.msra.mxu3 %v856_v32  ;;  %928 = vmatpush.msra.mxu0 %v707_v31 }
 0x252   : > { %v599_v34 = vpop.f32.mrf.mxu1 }
 0x253   : > { %v600_v35 = vadd.f32 %v599_v34, %v443_v33 }
 0x255   : > { %v611_v36 = vsel %vm405_vm2, %v600_v35, -inf }
 0x256   : > { %612 = vmax.xlane.f32.xlu2 %v611_v36 }
 0x258   : > { %v748_v37 = vpop.f32.mrf.mxu2 }
 0x259   : > { %v749_v41 = vadd.f32 %v748_v37, %v443_v33 }
 0x25a   : > { %v602_v42 = vpop.f32.mrf.mxu1 }
 0x25b   : > { %v603_v44 = vadd.f32 %v602_v42, %v444_v40  ;;  %v760_v46 = vsel %vm405_vm2, %v749_v41, -inf }
 0x25d   : > { %v614_v45 = vsel %vm405_vm2, %v603_v44, -inf }
 0x25e   : > { %615 = vmax.xlane.f32.xlu1 %v614_v45  ;;  %761 = vmax.xlane.f32.xlu2 %v760_v46 }
 0x260   : > { %v751_v47 = vpop.f32.mrf.mxu2 }
 0x261   : > { %v752_v49 = vadd.f32 %v751_v47, %v444_v40 }
 0x262   : > { %v605_v50 = vpop.f32.mrf.mxu1 }
 0x263   : > { %v606_v51 = vadd.f32 %v605_v50, %v445_v48  ;;  %v763_v52 = vsel %vm405_vm2, %v752_v49, -inf }
 0x264   : > { %764 = vmax.xlane.f32.xlu0 %v763_v52 }
 0x265   : > { %v617_v53 = vsel %vm405_vm2, %v606_v51, -inf }
 0x266   : > { %618 = vmax.xlane.f32.xlu2 %v617_v53 }
 0x268   : > { %v754_v54 = vpop.f32.mrf.mxu2 }
 0x269   : > { %v755_v57 = vadd.f32 %v754_v54, %v445_v48 }
 0x26a   : > { %v608_v63 = vpop.f32.mrf.mxu1 }
 0x26b   : > { %v766_v58 = vsel %vm405_vm2, %v755_v57, -inf  ;;  %v609_v0 = vadd.f32 %v608_v63, %v446_v59 }
 0x26d   : > { %v620_v1 = vsel %vm405_vm2, %v609_v0, -inf }
 0x26e   : > { %767 = vmax.xlane.f32.xlu2 %v766_v58 }
 0x270   : > { %v757_v60 = vpop.f32.mrf.mxu2 }
 0x271   : > { %v758_v61 = vadd.f32 %v757_v60, %v446_v59 }
 0x273   : > { %v769_v62 = vsel %vm405_vm2, %v758_v61, -inf }
 0x276   : > { %770 = vmax.xlane.f32.xlu2 %v769_v62 }
 0x27e   : > { %621 = vmax.xlane.f32.xlu2 %v620_v1 }
 0x2c9   : > { %v613_v2 = vpop.xlane.xlu2 %612 }
 0x2ca   : > { %v623_v9 = vsub.f32 %v600_v35, %v613_v2 }
 0x2cc   : > { %v627_v12 = vmul.f32 1.442695, %v623_v9 }
 0x2d1   : > { %v616_v3 = vpop.xlane.xlu1 %615  ;;  %v762_v4 = vpop.xlane.xlu2 %761 }
 0x2d2   : > { %v624_v5 = vsub.f32 %v603_v44, %v616_v3  ;;  %v772_v6 = vsub.f32 %v749_v41, %v762_v4 }
 0x2d4   : > { %v629_v7 = vmul.f32 1.442695, %v624_v5  ;;  %v776_v8 = vmul.f32 1.442695, %v772_v6 }
 0x2d6   : > { %2482 = vpow2.f32 %v629_v7 }
 0x2d7   : > { %2484 = vpow2.f32 %v776_v8  ;;  %v765_v10 = vpop.xlane.xlu0 %764 }
 0x2d8   : > { %v773_v11 = vsub.f32 %v752_v49, %v765_v10 }
 0x2d9   : > { %v619_v13 = vpop.xlane.xlu2 %618 }
 0x2da   : > { %v778_v14 = vmul.f32 1.442695, %v773_v11  ;;  %v625_v15 = vsub.f32 %v606_v51, %v619_v13 }
 0x2dc   : > { %v2918_v16 = vpop.eup %2482  ;;  %2486 = vpow2.f32 %v778_v14  ;;  %v631_v19 = vmul.f32 1.442695, %v625_v15 }
 0x2dd   : > { %v2920_v17 = vpop.eup %2484  ;;  %2488 = vpow2.f32 %v627_v12  ;;  %v638_v18 = vsel %vm405_vm2, %v2918_v16, 0.0 }
 0x2de   : > { %639 = vadd.xlane.f32.xlu1 %v638_v18  ;;  %v784_v20 = vsel %vm405_vm2, %v2920_v17, 0.0  ;;  %2490 = vpow2.f32 %v631_v19 }
 0x2df   : > { %785 = vadd.xlane.f32.xlu2 %v784_v20 }
 0x2e1   : > { %v768_v21 = vpop.xlane.xlu2 %767 }
 0x2e2   : > { %v2926_v22 = vpop.eup %2486  ;;  %v774_v23 = vsub.f32 %v755_v57, %v768_v21 }
 0x2e3   : > { %v2928_v24 = vpop.eup %2488  ;;  %v787_v25 = vsel %vm405_vm2, %v2926_v22, 0.0 }
 0x2e4   : > { %v780_v26 = vmul.f32 1.442695, %v774_v23  ;;  %788 = vadd.xlane.f32.xlu0 %v787_v25  ;;  %v635_v27 = vsel %vm405_vm2, %v2928_v24, 0.0  ;;  %v2934_v28 = vpop.eup %2490 }
 0x2e5   : > { %v641_v33 = vsel %vm405_vm2, %v2934_v28, 0.0 }
 0x2e6   : > { %2492 = vpow2.f32 %v780_v26 }
 0x2e7   : > { %636 = vadd.xlane.f32.xlu2 %v635_v27 }
 0x2e9   : > { %v771_v31 = vpop.xlane.xlu2 %770 }
 0x2ea   : > { %v775_v32 = vsub.f32 %v758_v61, %v771_v31 }
 0x2ec   : > { %v2938_v34 = vpop.eup %2492  ;;  %v782_v35 = vmul.f32 1.442695, %v775_v32  ;;  %642 = vadd.xlane.f32.xlu0 %v641_v33 }
 0x2ed   : > { %v790_v36 = vsel %vm405_vm2, %v2938_v34, 0.0 }
 0x2ee   : > { %2494 = vpow2.f32 %v782_v35 }
 0x2ef   : > { %791 = vadd.xlane.f32.xlu2 %v790_v36 }
 0x2f1   : > { %v622_v37 = vpop.xlane.xlu2 %621 }
 0x2f2   : > { %v626_v40 = vsub.f32 %v609_v0, %v622_v37 }
 0x2f4   : > { %v2942_v41 = vpop.eup %2494  ;;  %v633_v42 = vmul.f32 1.442695, %v626_v40 }
 0x2f5   : > { %v793_v44 = vsel %vm405_vm2, %v2942_v41, 0.0 }
 0x2f6   : > { %2496 = vpow2.f32 %v633_v42  ;;  %794 = vadd.xlane.f32.xlu1 %v793_v44 }
 0x2fc   : > { %v2946_v45 = vpop.eup %2496 }
 0x2fd   : > { %v644_v46 = vsel %vm405_vm2, %v2946_v45, 0.0 }
 0x2fe   : > { %645 = vadd.xlane.f32.xlu2 %v644_v46 }
 0x351   : > { %v2950_v47 = vpop.xlane.xlu1 %639 }
 0x352   : > { %v786_v48 = vpop.xlane.xlu2 %785  ;;  %vm667_vm9 = vweird.f32 %v2950_v47  ;;  %v673_v42 = vand.u32 2147483648, %v2950_v47 }
 0x353   : > { %2498 = vrcp.f32 %v786_v48  ;;  %v807_v58 = vand.u32 2147483648, %v786_v48  ;;  %v805_v61 = vand.u32 2147483647, %v786_v48  ;;  %vm801_vm11 = vweird.f32 %v786_v48 }
 0x354   : > { %2500 = vrcp.f32 %v2950_v47 }
 0x355   : > { %v808_v3 = vor.u32 1.1754944e-38, %v807_v58  ;;  %vm806_vm13 = vcmp.eq.f32.partialorder %v805_v61, 8.507059e+37 }
 0x357   : > { %v789_v49 = vpop.xlane.xlu0 %788 }
 0x358   : > { %2502 = vrcp.f32 %v789_v49  ;;  %v822_v6 = vand.u32 2147483648, %v789_v49  ;;  %vm816_vm15 = vweird.f32 %v789_v49  ;;  %v820_v13 = vand.u32 2147483647, %v789_v49 }
 0x359   : > { %v2499_v50 = vpop.eup %2498 }
 0x35a   : > { %v2953_v51 = vpop.eup %2500  ;;  %v797_v52 = vmul.f32 %v2499_v50, %v786_v48  ;;  %v637_v53 = vpop.xlane.xlu2 %636  ;;  %vm802_vm10 = vweird.f32 %v2499_v50  ;;  %v823_v23 = vor.u32 1.1754944e-38, %v822_v6  ;;  %vm821_vm4 = vcmp.eq.f32.partialorder %v820_v13, 8.507059e+37 }
 0x35b   : > { %2504 = vrcp.f32 %v637_v53  ;;  %v663_v57 = vmul.f32 %v2953_v51, %v2950_v47  ;;  %vm803_vm12 = vmor %vm801_vm11, %vm802_vm10  ;;  %v656_v15 = vand.u32 2147483647, %v637_v53  ;;  %v658_v18 = vand.u32 2147483648, %v637_v53 }
 0x35c   : > { %v798_v54 = vsub.f32 1.0, %v797_v52  ;;  %vm652_vm3 = vweird.f32 %v637_v53  ;;  %vm668_vm6 = vweird.f32 %v2953_v51 }
 0x35d   : > { %v664_v2 = vsub.f32 1.0, %v663_v57  ;;  %vm657_vm8 = vcmp.eq.f32.partialorder %v656_v15, 8.507059e+37  ;;  %v659_v31 = vor.u32 1.1754944e-38, %v658_v18  ;;  %vm2979_vm10 = vmor %vm667_vm9, %vm668_vm6 }
 0x35e   : > { %v2503_v59 = vpop.eup %2502  ;;  %v799_v60 = vmul.f32 %v2499_v50, %v798_v54  ;;  %v944_v54 = vperm.slane %v2852_v43, 3 }
 0x35f   : > { %v812_v62 = vmul.f32 %v2503_v59, %v789_v49  ;;  %v2957_v63 = vpop.xlane.xlu0 %642  ;;  %vm817_vm14 = vweird.f32 %v2503_v59  ;;  %v665_v14 = vmul.f32 %v2953_v51, %v664_v2 }
 0x360   : > { %v800_v0 = vadd.f32 %v2499_v50, %v799_v60  ;;  %2506 = vrcp.f32 %v2957_v63  ;;  %vm818_vm1 = vmor %vm816_vm15, %vm817_vm14 }
 0x361   : > { %v2505_v1 = vpop.eup %2504  ;;  %v813_v4 = vsub.f32 1.0, %v812_v62  ;;  %v666_v35 = vadd.f32 %v2953_v51, %v665_v14 }
 0x362   : > { %v804_v5 = vsel %vm803_vm12, %v2499_v50, %v800_v0  ;;  %v648_v7 = vmul.f32 %v2505_v1, %v637_v53  ;;  %v792_v8 = vpop.xlane.xlu2 %791  ;;  %vm653_vm0 = vweird.f32 %v2505_v1  ;;  %v671_v50 = vand.u32 2147483647, %v2950_v47 }
 0x363   : > { %v809_v9 = vsel %vm806_vm13, %v808_v3, %v804_v5  ;;  %v814_v10 = vmul.f32 %v2503_v59, %v813_v4  ;;  %2508 = vrcp.f32 %v792_v8  ;;  %vm654_vm7 = vmor %vm652_vm3, %vm653_vm0  ;;  %v837_v52 = vand.u32 2147483648, %v792_v8 }
 0x364   : > { %v649_v11 = vsub.f32 1.0, %v648_v7  ;;  %v810_v12 = vmul.f32 %v2920_v17, %v809_v9  ;;  %v835_v53 = vand.u32 2147483647, %v792_v8  ;;  %vm831_vm12 = vweird.f32 %v792_v8 }
 0x365   : > { %v815_v19 = vadd.f32 %v2503_v59, %v814_v10  ;;  %vm672_vm13 = vcmp.eq.f32.partialorder %v671_v50, 8.507059e+37  ;;  %v838_v60 = vor.u32 1.1754944e-38, %v837_v52 }
 0x366   : > { %v2962_v20 = vpop.eup %2506  ;;  %v650_v21 = vmul.f32 %v2505_v1, %v649_v11  ;;  %2283 = vmatmul.msk.f32.vlgmr.msra.gmra.mxu3 %vm405_vm2, %v810_v12  ;;  %vm836_vm15 = vcmp.eq.f32.partialorder %v835_v53, 8.507059e+37 }
 0x367   : > { %v678_v25 = vmul.f32 %v2962_v20, %v2957_v63  ;;  %v819_v26 = vsel %vm818_vm1, %v2503_v59, %v815_v19  ;;  %vm683_vm0 = vweird.f32 %v2962_v20  ;;  %vm682_vm1 = vweird.f32 %v2957_v63 }
 0x368   : > { %v651_v27 = vadd.f32 %v2505_v1, %v650_v21  ;;  %v824_v33 = vsel %vm821_vm4, %v823_v23, %v819_v26  ;;  %vm684_vm4 = vmor %vm682_vm1, %vm683_vm0 }
 0x369   : > { %v2509_v17 = vpop.eup %2508  ;;  %v2968_v32 = vpop.xlane.xlu1 %794  ;;  %v679_v37 = vsub.f32 1.0, %v678_v25  ;;  %v825_v48 = vmul.f32 %v2926_v22, %v824_v33  ;;  %v670_v22 = vsel %vm2979_vm10, %v2953_v51, %v666_v35  ;;  %v688_v51 = vand.u32 2147483648, %v2957_v63 }
 0x36a   : > { %v655_v36 = vsel %vm654_vm7, %v2505_v1, %v651_v27  ;;  %v827_v40 = vmul.f32 %v2509_v17, %v792_v8  ;;  %2510 = vrcp.f32 %v2968_v32  ;;  %vm832_vm11 = vweird.f32 %v2509_v17 }
 0x36b   : > { %v660_v44 = vsel %vm657_vm8, %v659_v31, %v655_v36  ;;  %v680_v57 = vmul.f32 %v2962_v20, %v679_v37  ;;  %vm833_vm14 = vmor %vm831_vm12, %vm832_vm11  ;;  %v852_v5 = vand.u32 2147483648, %v2968_v32  ;;  %v686_v8 = vand.u32 2147483647, %v2957_v63 }
 0x36c   : > { %v828_v46 = vsub.f32 1.0, %v827_v40  ;;  %v661_v49 = vmul.f32 %v2928_v24, %v660_v44  ;;  %v674_v24 = vor.u32 1.1754944e-38, %v673_v42  ;;  %v850_v10 = vand.u32 2147483647, %v2968_v32 }
 0x36d   : > { %v681_v2 = vadd.f32 %v2962_v20, %v680_v57  ;;  %v689_v12 = vor.u32 1.1754944e-38, %v688_v51  ;;  %vm846_vm6 = vweird.f32 %v2968_v32  ;;  %v853_v14 = vor.u32 1.1754944e-38, %v852_v5 }
 0x36e   : > { %v829_v58 = vmul.f32 %v2509_v17, %v828_v46  ;;  %2284 = vmatmul.msk.f32.gmra.mxu3 %vm405_vm2, %v825_v48  ;;  %2287 = vmatmul.msk.f32.vlgmr.msra.gmra.mxu0 %vm405_vm2, %v661_v49  ;;  %v675_v0 = vsel %vm672_vm13, %v674_v24, %v670_v22  ;;  %vm687_vm8 = vcmp.eq.f32.partialorder %v686_v8, 8.507059e+37  ;;  %vm851_vm9 = vcmp.eq.f32.partialorder %v850_v10, 8.507059e+37 }
 0x36f   : > { %v676_v7 = vmul.f32 %v2918_v16, %v675_v0  ;;  %v685_v11 = vsel %vm684_vm4, %v2962_v20, %v681_v2  ;;  %v2687_v5 = vmov 16.0  }
 0x370   : > { %v2511_v47 = vpop.eup %2510  ;;  %v830_v59 = vadd.f32 %v2509_v17, %v829_v58  ;;  %v690_v15 = vsel %vm687_vm8, %v689_v12, %v685_v11 }
 0x371   : > { %v842_v61 = vmul.f32 %v2511_v47, %v2968_v32  ;;  %v646_v62 = vpop.xlane.xlu2 %645  ;;  %vm847_vm3 = vweird.f32 %v2511_v47  ;;  %v691_v25 = vmul.f32 %v2934_v28, %v690_v15  ;;  %v2407_v28 = vld [vmem:[%s3387_s4 + $0x18] sm:$0xff] }
 0x372   : > { %2512 = vrcp.f32 %v646_v62  ;;  %v834_v1 = vsel %vm833_vm14, %v2509_v17, %v830_v59  ;;  %vm848_vm7 = vmor %vm846_vm6, %vm847_vm3  ;;  %v703_v23 = vand.u32 2147483648, %v646_v62  ;;  %v701_v26 = vand.u32 2147483647, %v646_v62  ;;  %964 = vmatpush.bf16.msra.mxu1 %v2407_v28 }
 0x373   : > { %v843_v3 = vsub.f32 1.0, %v842_v61  ;;  %v839_v4 = vsel %vm836_vm15, %v838_v60, %v834_v1  ;;  %vm697_vm11 = vweird.f32 %v646_v62  ;;  %2514 = vrcp.f32 %v2687_v5 }
 0x374   : > { %v840_v6 = vmul.f32 %v2938_v34, %v839_v4  ;;  %v704_v17 = vor.u32 1.1754944e-38, %v703_v23  ;;  %vm702_vm13 = vcmp.eq.f32.partialorder %v701_v26, 8.507059e+37 }
 0x375   : > { %v844_v9 = vmul.f32 %v2511_v47, %v843_v3 }
 0x376   : > { %2285 = vmatmul.msk.f32.gmra.mxu3 %vm405_vm2, %v840_v6  ;;  %2288 = vmatmul.msk.f32.gmra.mxu0 %vm405_vm2, %v676_v7 }
 0x377   : > { %v845_v13 = vadd.f32 %v2511_v47, %v844_v9 }
 0x378   : > { %v2513_v34 = vpop.eup %2512 }
 0x379   : > { %v693_v16 = vmul.f32 %v2513_v34, %v646_v62  ;;  %v849_v63 = vsel %vm848_vm7, %v2511_v47, %v845_v13  ;;  %vm698_vm10 = vweird.f32 %v2513_v34 }
 0x37a   : > { %v854_v18 = vsel %vm851_vm9, %v853_v14, %v849_v63  ;;  %vm699_vm12 = vmor %vm697_vm11, %vm698_vm10 }
 0x37b   : > { %v694_v19 = vsub.f32 1.0, %v693_v16  ;;  %v855_v21 = vmul.f32 %v2942_v41, %v854_v18 }
 0x37d   : > { %v695_v20 = vmul.f32 %v2513_v34, %v694_v19 }
 0x37e   : > { %2286 = vmatmul.msk.f32.gmra.mxu3 %vm405_vm2, %v855_v21  ;;  %2289 = vmatmul.msk.f32.gmra.mxu0 %vm405_vm2, %v691_v25 }
 0x37f   : > { %v696_v27 = vadd.f32 %v2513_v34, %v695_v20 }
 0x381   : > { %v700_v31 = vsel %vm699_vm12, %v2513_v34, %v696_v27 }
 0x382   : > { %v705_v32 = vsel %vm702_vm13, %v704_v17, %v700_v31 }
 0x383   : > { %v706_v33 = vmul.f32 %v2946_v45, %v705_v32 }
 0x386   : > { %2290 = vmatmul.msk.f32.gmra.mxu0 %vm405_vm2, %v706_v33 }
 0x3e9   : > { %v889_v41 = vpop.f32.mrf.mxu3 }
 0x3eb   : > { %v930_v35 = vpop.f32.mrf.mxu0 }
 0x3ec   : > { %v931_v40 = vadd.f32 %v930_v35, %v889_v41  ;;  %v2408_v41 = vld [vmem:[%s3387_s4 + $0x20] sm:$0xff] }
 0x3ed   : > { %1107 = vmatpush.bf16.msra.mxu2 %v2408_v41 }
 0x3f1   : > { %v892_v36 = vpop.f32.mrf.mxu3 }
 0x3f3   : > { %v933_v37 = vpop.f32.mrf.mxu0 }
 0x3f4   : > { %v934_v42 = vadd.f32 %v933_v37, %v892_v36 }
 0x3f6   : > { %v942_v44 = vpack.c.bf16 %v934_v42, %v931_v40 }
 0x3f8   : > { %2295 = vmatmul.msk.bf16.vlgmr.msra.gmra.mxu1 %vm472_vm5, %v942_v44 }
 0x3f9   : > { %v895_v46 = vpop.f32.mrf.mxu3 }
 0x3fb   : > { %v936_v48 = vpop.f32.mrf.mxu0 }
 0x3fc   : > { %v937_v50 = vadd.f32 %v936_v48, %v895_v46 }
 0x401   : > { %v898_v49 = vpop.f32.mrf.mxu3 }
 0x403   : > { %v939_v45 = vpop.f32.mrf.mxu0 }
 0x404   : > { %v940_v52 = vadd.f32 %v939_v45, %v898_v49 }
 0x406   : > { %v943_v53 = vpack.c.bf16 %v940_v52, %v937_v50 }
 0x408   : > { %2296 = vmatmul.msk.bf16.gmra.mxu1 %vm472_vm5, %v943_v53 }
 0x475   : > { %v966_v57 = vpop.f32.mrf.mxu1 }
 0x476   : > { %v967_v58 = vadd.f32 %v966_v57, %v944_v54 }
 0x478   : > { %v976_v22 = vadd.f32 %v967_v58, %v2834_v29 }
 0x47a   : > { %v980_v24 = vsel %vm472_vm5, %v976_v22, 0.0 }
 0x47b   : > { %981 = vadd.xlane.f32.xlu0 %v980_v24 }
 0x47d   : > { %v968_v47 = vpop.f32.mrf.mxu1 }
 0x47e   : > { %v969_v59 = vadd.f32 %v968_v47, %v944_v54 }
 0x480   : > { %v977_v60 = vadd.f32 %v969_v59, %v2836_v30  ;;  %v2515_v30 = vpop.eup %2514 }
 0x481   : > { %v993_v6 = vmul.f32 16.0, %v2515_v30  ;;  %vm997_vm14 = vweird.f32 %v2515_v30 }
 0x482   : > { %v983_v61 = vsel %vm472_vm5, %v977_v60, 0.0 }
 0x483   : > { %984 = vadd.xlane.f32.xlu1 %v983_v61  ;;  %v994_v7 = vsub.f32 1.0, %v993_v6  ;;  %v1075_v61 = vperm.slane %v2852_v43, 6 }
 0x485   : > { %v971_v62 = vpop.f32.mrf.mxu1  ;;  %v995_v8 = vmul.f32 %v2515_v30, %v994_v7 }
 0x486   : > { %v972_v0 = vadd.f32 %v971_v62, %v944_v54 }
 0x487   : > { %v996_v9 = vadd.f32 %v2515_v30, %v995_v8 }
 0x488   : > { %v978_v1 = vadd.f32 %v972_v0, %v2842_v38 }
 0x489   : > { %v3023_v10 = vsel %vm997_vm14, %v2515_v30, %v996_v9 }
 0x48a   : > { %v986_v2 = vsel %vm472_vm5, %v978_v1, 0.0 }
 0x48b   : > { %987 = vadd.xlane.f32.xlu2 %v986_v2 }
 0x48d   : > { %v973_v51 = vpop.f32.mrf.mxu1 }
 0x48e   : > { %v974_v3 = vadd.f32 %v973_v51, %v944_v54 }
 0x490   : > { %v979_v29 = vadd.f32 %v974_v3, %v2844_v39 }
 0x492   : > { %v989_v4 = vsel %vm472_vm5, %v979_v29, 0.0 }
 0x493   : > { %990 = vadd.xlane.f32.xlu0 %v989_v4 }
 0x4ee   : > { %v982_v38 = vpop.xlane.xlu0 %981 }
 0x4ef   : > { %v999_v11 = vmul.f32 %v3023_v10, %v982_v38 }
 0x4f1   : > { %v1003_v12 = vsub.f32 %v976_v22, %v999_v11 }
 0x4f3   : > { %v1007_v13 = vmul.f32 %v1003_v12, %v1003_v12 }
 0x4f5   : > { %v1011_v39 = vsel %vm472_vm5, %v1007_v13, 0.0 }
 0x4f6   : > { %v985_v34 = vpop.xlane.xlu1 %984  ;;  %1012 = vadd.xlane.f32.xlu1 %v1011_v39 }
 0x4f7   : > { %v1000_v14 = vmul.f32 %v3023_v10, %v985_v34 }
 0x4f9   : > { %v1004_v16 = vsub.f32 %v977_v60, %v1000_v14 }
 0x4fb   : > { %v1008_v63 = vmul.f32 %v1004_v16, %v1004_v16 }
 0x4fd   : > { %v1014_v15 = vsel %vm472_vm5, %v1008_v63, 0.0 }
 0x4fe   : > { %1015 = vadd.xlane.f32.xlu2 %v1014_v15  ;;  %v988_v18 = vpop.xlane.xlu2 %987 }
 0x4ff   : > { %v1001_v19 = vmul.f32 %v3023_v10, %v988_v18 }
 0x501   : > { %v3030_v21 = vsub.f32 %v978_v1, %v1001_v19 }
 0x503   : > { %v1009_v23 = vmul.f32 %v3030_v21, %v3030_v21 }
 0x505   : > { %v1017_v25 = vsel %vm472_vm5, %v1009_v23, 0.0 }
 0x506   : > { %v991_v20 = vpop.xlane.xlu0 %990  ;;  %1018 = vadd.xlane.f32.xlu0 %v1017_v25 }
 0x507   : > { %v1002_v26 = vmul.f32 %v3023_v10, %v991_v20 }
 0x509   : > { %v3036_v27 = vsub.f32 %v979_v29, %v1002_v26  ;;  %v1080_v29 = vperm.slane %v2852_v43, 7 }
 0x50b   : > { %v1010_v17 = vmul.f32 %v3036_v27, %v3036_v27 }
 0x50d   : > { %v1020_v31 = vsel %vm472_vm5, %v1010_v17, 0.0 }
 0x50e   : > { %1021 = vadd.xlane.f32.xlu1 %v1020_v31  ;;  %v2410_v31 = vld [vmem:[%s3387_s4 + $0x30] sm:$0xff] }
 0x50f   : > { %1150 = vmatpush.bf16.msrb.mxu3 %v2410_v31 }
 0x569   : > { %v1013_v32 = vpop.xlane.xlu1 %1012 }
 0x56a   : > { %v1023_v33 = vmul.f32 %v1013_v32, %v3023_v10 }
 0x56c   : > { %v1027_v28 = vadd.f32 1e-05, %v1023_v33 }
 0x56e   : > { %2516 = vrsqrt.f32 %v1027_v28  ;;  %vm1037_vm0 = vweird.f32 %v1027_v28 }
 0x571   : > { %v1016_v35 = vpop.xlane.xlu2 %1015 }
 0x572   : > { %v1024_v36 = vmul.f32 %v1016_v35, %v3023_v10 }
 0x574   : > { %v2517_v37 = vpop.eup %2516  ;;  %v1028_v40 = vadd.f32 1e-05, %v1024_v36 }
 0x575   : > { %v1032_v42 = vmul.f32 %v2517_v37, %v1027_v28  ;;  %vm1038_vm15 = vweird.f32 %v2517_v37 }
 0x576   : > { %2518 = vrsqrt.f32 %v1028_v40  ;;  %vm1039_vm1 = vmor %vm1037_vm0, %vm1038_vm15  ;;  %vm1047_vm4 = vweird.f32 %v1028_v40 }
 0x577   : > { %v1033_v44 = vmul.f32 %v2517_v37, %v1032_v42 }
 0x579   : > { %v1034_v46 = vmul.f32 0.5, %v1033_v44  ;;  %v1019_v48 = vpop.xlane.xlu0 %1018 }
 0x57a   : > { %v1025_v49 = vmul.f32 %v1019_v48, %v3023_v10 }
 0x57b   : > { %v1035_v45 = vsub.f32 1.5, %v1034_v46 }
 0x57c   : > { %v2519_v50 = vpop.eup %2518  ;;  %v1029_v52 = vadd.f32 1e-05, %v1025_v49 }
 0x57d   : > { %v1036_v53 = vmul.f32 %v2517_v37, %v1035_v45  ;;  %v1042_v54 = vmul.f32 %v2519_v50, %v1028_v40  ;;  %vm1048_vm3 = vweird.f32 %v2519_v50 }
 0x57e   : > { %2520 = vrsqrt.f32 %v1029_v52  ;;  %vm1049_vm6 = vmor %vm1047_vm4, %vm1048_vm3  ;;  %vm1057_vm8 = vweird.f32 %v1029_v52 }
 0x57f   : > { %v1043_v57 = vmul.f32 %v2519_v50, %v1042_v54  ;;  %v1040_v58 = vsel %vm1039_vm1, %v2517_v37, %v1036_v53 }
 0x580   : > { %v1071_v62 = vmul.f32 %v1040_v58, %v1003_v12 }
 0x581   : > { %v1044_v22 = vmul.f32 0.5, %v1043_v57  ;;  %v1022_v24 = vpop.xlane.xlu1 %1021 }
 0x582   : > { %v1026_v47 = vmul.f32 %v1022_v24, %v3023_v10  ;;  %v1076_v4 = vmul.f32 %v1075_v61, %v1071_v62 }
 0x583   : > { %v1045_v59 = vsub.f32 1.5, %v1044_v22 }
 0x584   : > { %v2521_v60 = vpop.eup %2520  ;;  %v1030_v0 = vadd.f32 1e-05, %v1026_v47  ;;  %v1081_v9 = vadd.f32 %v1080_v29, %v1076_v4 }
 0x585   : > { %v1046_v1 = vmul.f32 %v2519_v50, %v1045_v59  ;;  %v1052_v2 = vmul.f32 %v2521_v60, %v1029_v52  ;;  %vm1058_vm7 = vweird.f32 %v2521_v60 }
 0x586   : > { %2522 = vrsqrt.f32 %v1030_v0  ;;  %vm1059_vm9 = vmor %vm1057_vm8, %vm1058_vm7  ;;  %vm1067_vm11 = vweird.f32 %v1030_v0 }
 0x587   : > { %v1050_v51 = vsel %vm1049_vm6, %v2519_v50, %v1046_v1  ;;  %v1053_v3 = vmul.f32 %v2521_v60, %v1052_v2  ;;  %v1125_v50 = vperm.slane %v2852_v43, 5 }
 0x588   : > { %v1072_v5 = vmul.f32 %v1050_v51, %v1004_v16 }
 0x589   : > { %v1054_v30 = vmul.f32 0.5, %v1053_v3 }
 0x58a   : > { %v1077_v6 = vmul.f32 %v1075_v61, %v1072_v5 }
 0x58b   : > { %v1055_v7 = vsub.f32 1.5, %v1054_v30 }
 0x58c   : > { %v2523_v8 = vpop.eup %2522  ;;  %v1082_v38 = vadd.f32 %v1080_v29, %v1077_v6 }
 0x58d   : > { %v1056_v11 = vmul.f32 %v2521_v60, %v1055_v7  ;;  %v1062_v12 = vmul.f32 %v2523_v8, %v1030_v0  ;;  %vm1068_vm10 = vweird.f32 %v2523_v8 }
 0x58e   : > { %v1085_v13 = vpack.c.bf16 %v1082_v38, %v1081_v9  ;;  %vm1069_vm12 = vmor %vm1067_vm11, %vm1068_vm10 }
 0x58f   : > { %v1063_v39 = vmul.f32 %v2523_v8, %v1062_v12  ;;  %v1060_v34 = vsel %vm1059_vm9, %v2521_v60, %v1056_v11 }
 0x590   : > { %2301 = vmatmul.msk.bf16.vlgmr.msra.gmra.mxu2 %vm472_vm5, %v1085_v13  ;;  %v1073_v16 = vmul.f32 %v1060_v34, %v3030_v21  ;;  %v2409_v21 = vld [vmem:[%s3387_s4 + $0x28] sm:$0xff] }
 0x591   : > { %v1064_v14 = vmul.f32 0.5, %v1063_v39  ;;  %1151 = vmatpush.bf16.msrb.mxu3 %v2409_v21 }
 0x592   : > { %v1078_v23 = vmul.f32 %v1075_v61, %v1073_v16 }
 0x593   : > { %v1065_v63 = vsub.f32 1.5, %v1064_v14 }
 0x594   : > { %v1083_v20 = vadd.f32 %v1080_v29, %v1078_v23 }
 0x595   : > { %v1066_v15 = vmul.f32 %v2523_v8, %v1065_v63 }
 0x597   : > { %v1070_v18 = vsel %vm1069_vm12, %v2523_v8, %v1066_v15 }
 0x598   : > { %v1074_v19 = vmul.f32 %v1070_v18, %v3036_v27  ;;  %v1087_v27 = vperm.slane %v2852_v43, 4 }
 0x59a   : > { %v1079_v25 = vmul.f32 %v1075_v61, %v1074_v19 }
 0x59c   : > { %v1084_v26 = vadd.f32 %v1080_v29, %v1079_v25  ;;  %v2412_v25 = vld [vmem:[%s3387_s4 + $0x40] sm:$0xff] }
 0x59d   : > { %1331 = vmatpush.bf16.msrb.mxu1 %v2412_v25 }
 0x59e   : > { %v1086_v17 = vpack.c.bf16 %v1084_v26, %v1083_v20 }
 0x5a0   : > { %2302 = vmatmul.msk.bf16.gmra.mxu2 %vm472_vm5, %v1086_v17 }
 0x613   : > { %v1109_v32 = vpop.f32.mrf.mxu2 }
 0x614   : > { %v1110_v33 = vadd.f32 %v1109_v32, %v1087_v27 }
 0x616   : > { %v1119_v35 = vmax.f32 %v1110_v33, 0.0 }
 0x61b   : > { %v1111_v28 = vpop.f32.mrf.mxu2 }
 0x61c   : > { %v1112_v41 = vadd.f32 %v1111_v28, %v1087_v27 }
 0x61e   : > { %v1120_v36 = vmax.f32 %v1112_v41, 0.0 }
 0x620   : > { %v1123_v37 = vpack.c.bf16 %v1120_v36, %v1119_v35 }
 0x622   : > { %2311 = vmatmul.msk.bf16.vlgmr.msrb.gmra.mxu3 %vm405_vm2, %v1123_v37 }
 0x623   : > { %v1114_v40 = vpop.f32.mrf.mxu2 }
 0x624   : > { %v1115_v42 = vadd.f32 %v1114_v40, %v1087_v27 }
 0x626   : > { %v1121_v48 = vmax.f32 %v1115_v42, 0.0 }
 0x62b   : > { %v1116_v44 = vpop.f32.mrf.mxu2 }
 0x62c   : > { %v1117_v46 = vadd.f32 %v1116_v44, %v1087_v27 }
 0x62e   : > { %v1122_v49 = vmax.f32 %v1117_v46, 0.0 }
 0x630   : > { %v1124_v45 = vpack.c.bf16 %v1122_v49, %v1121_v48  ;;  %v462_v48 = vld [vmem:[#allocation2 + $0x8] sm:$0xff] }
 0x632   : > { %2312 = vmatmul.msk.bf16.gmra.mxu3 %vm405_vm2, %v1124_v45 }
 0x6a5   : > { %v1153_v52 = vpop.f32.mrf.mxu3 }
 0x6a6   : > { %v1154_v53 = vadd.f32 %v1153_v52, %v1125_v50 }
 0x6a8   : > { %v1163_v54 = vadd.f32 %v1154_v53, %v1081_v9 }
 0x6aa   : > { %v1167_v57 = vsel %vm472_vm5, %v1163_v54, 0.0 }
 0x6ab   : > { %1168 = vadd.xlane.f32.xlu2 %v1167_v57  ;;  %v1255_v57 = vperm.slane %v462_v48, 0 }
 0x6ad   : > { %v1155_v58 = vpop.f32.mrf.mxu3 }
 0x6ae   : > { %v1156_v22 = vadd.f32 %v1155_v58, %v1125_v50 }
 0x6b0   : > { %v1164_v24 = vadd.f32 %v1156_v22, %v1082_v38 }
 0x6b2   : > { %v1170_v47 = vsel %vm472_vm5, %v1164_v24, 0.0 }
 0x6b3   : > { %1171 = vadd.xlane.f32.xlu0 %v1170_v47 }
 0x6b5   : > { %v1158_v59 = vpop.f32.mrf.mxu3 }
 0x6b6   : > { %v1159_v60 = vadd.f32 %v1158_v59, %v1125_v50 }
 0x6b8   : > { %v1165_v61 = vadd.f32 %v1159_v60, %v1083_v20  ;;  %v2411_v20 = vld [vmem:[%s3387_s4 + $0x38] sm:$0xff] }
 0x6b9   : > { %1305 = vmatpush.bf16.msrb.mxu0 %v2411_v20  ;;  %v3122_v20 = vld [vmem:[#allocation2 + $0x10] sm:$0xff] }
 0x6ba   : > { %v1173_v62 = vsel %vm472_vm5, %v1165_v61, 0.0 }
 0x6bb   : > { %1174 = vadd.xlane.f32.xlu1 %v1173_v62 }
 0x6bd   : > { %v1160_v0 = vpop.f32.mrf.mxu3 }
 0x6be   : > { %v1161_v43 = vadd.f32 %v1160_v0, %v1125_v50 }
 0x6c0   : > { %v1166_v1 = vadd.f32 %v1161_v43, %v1084_v26  ;;  %v2413_v26 = vld [vmem:[%s3387_s4 + $0x48] sm:$0xff] }
 0x6c1   : > { %1357 = vmatpush.bf16.msrb.mxu2 %v2413_v26  ;;  %v1317_v26 = vperm.slane %v3122_v20, 1 }
 0x6c2   : > { %v1176_v2 = vsel %vm472_vm5, %v1166_v1, 0.0 }
 0x6c3   : > { %1177 = vadd.xlane.f32.xlu2 %v1176_v2 }
 0x71e   : > { %v1169_v51 = vpop.xlane.xlu2 %1168 }
 0x71f   : > { %v1179_v3 = vmul.f32 %v1169_v51, %v3023_v10 }
 0x721   : > { %v1183_v29 = vsub.f32 %v1163_v54, %v1179_v3 }
 0x723   : > { %v1187_v4 = vmul.f32 %v1183_v29, %v1183_v29 }
 0x725   : > { %v1191_v5 = vsel %vm472_vm5, %v1187_v4, 0.0 }
 0x726   : > { %v1172_v30 = vpop.xlane.xlu0 %1171  ;;  %1192 = vadd.xlane.f32.xlu0 %v1191_v5 }
 0x727   : > { %v1180_v6 = vmul.f32 %v1172_v30, %v3023_v10 }
 0x729   : > { %v3071_v7 = vsub.f32 %v1164_v24, %v1180_v6 }
 0x72b   : > { %v1188_v8 = vmul.f32 %v3071_v7, %v3071_v7 }
 0x72d   : > { %v1194_v9 = vsel %vm472_vm5, %v1188_v8, 0.0 }
 0x72e   : > { %v1175_v38 = vpop.xlane.xlu1 %1174  ;;  %1195 = vadd.xlane.f32.xlu1 %v1194_v9 }
 0x72f   : > { %v1181_v11 = vmul.f32 %v1175_v38, %v3023_v10 }
 0x731   : > { %v3077_v12 = vsub.f32 %v1165_v61, %v1181_v11  ;;  %v1260_v61 = vperm.slane %v462_v48, 1 }
 0x733   : > { %v1189_v13 = vmul.f32 %v3077_v12, %v3077_v12 }
 0x735   : > { %v1197_v39 = vsel %vm472_vm5, %v1189_v13, 0.0 }
 0x736   : > { %1198 = vadd.xlane.f32.xlu2 %v1197_v39  ;;  %v1178_v34 = vpop.xlane.xlu2 %1177 }
 0x737   : > { %v1182_v14 = vmul.f32 %v1178_v34, %v3023_v10 }
 0x739   : > { %v3083_v63 = vsub.f32 %v1166_v1, %v1182_v14 }
 0x73b   : > { %v1190_v16 = vmul.f32 %v3083_v63, %v3083_v63 }
 0x73d   : > { %v1200_v15 = vsel %vm472_vm5, %v1190_v16, 0.0 }
 0x73e   : > { %1201 = vadd.xlane.f32.xlu0 %v1200_v15 }
 0x799   : > { %v1193_v18 = vpop.xlane.xlu0 %1192 }
 0x79a   : > { %v1203_v19 = vmul.f32 %v1193_v18, %v3023_v10 }
 0x79c   : > { %v1207_v23 = vadd.f32 1e-05, %v1203_v19 }
 0x79e   : > { %2524 = vrsqrt.f32 %v1207_v23  ;;  %vm1217_vm14 = vweird.f32 %v1207_v23 }
 0x7a1   : > { %v1196_v17 = vpop.xlane.xlu1 %1195 }
 0x7a2   : > { %v1204_v31 = vmul.f32 %v1196_v17, %v3023_v10 }
 0x7a4   : > { %v2525_v21 = vpop.eup %2524  ;;  %v1208_v32 = vadd.f32 1e-05, %v1204_v31 }
 0x7a5   : > { %v1212_v27 = vmul.f32 %v2525_v21, %v1207_v23  ;;  %vm1218_vm13 = vweird.f32 %v2525_v21 }
 0x7a6   : > { %2526 = vrsqrt.f32 %v1208_v32  ;;  %vm1219_vm15 = vmor %vm1217_vm14, %vm1218_vm13  ;;  %vm1227_vm1 = vweird.f32 %v1208_v32 }
 0x7a7   : > { %v1213_v33 = vmul.f32 %v2525_v21, %v1212_v27  ;;  %v1285_v27 = vperm.slane %v3122_v20, 0 }
 0x7a9   : > { %v1214_v28 = vmul.f32 0.5, %v1213_v33  ;;  %v1199_v41 = vpop.xlane.xlu2 %1198 }
 0x7aa   : > { %v1205_v35 = vmul.f32 %v1199_v41, %v3023_v10 }
 0x7ab   : > { %v1215_v36 = vsub.f32 1.5, %v1214_v28  ;;  %v1343_v28 = vperm.slane %v3122_v20, 2 }
 0x7ac   : > { %v2527_v37 = vpop.eup %2526  ;;  %v1209_v40 = vadd.f32 1e-05, %v1205_v35 }
 0x7ad   : > { %v1216_v42 = vmul.f32 %v2525_v21, %v1215_v36  ;;  %v1222_v44 = vmul.f32 %v2527_v37, %v1208_v32  ;;  %vm1228_vm0 = vweird.f32 %v2527_v37 }
 0x7ae   : > { %2528 = vrsqrt.f32 %v1209_v40  ;;  %vm1229_vm3 = vmor %vm1227_vm1, %vm1228_vm0  ;;  %vm1237_vm6 = vweird.f32 %v1209_v40 }
 0x7af   : > { %v1223_v46 = vmul.f32 %v2527_v37, %v1222_v44  ;;  %v1220_v49 = vsel %vm1219_vm15, %v2525_v21, %v1216_v42 }
 0x7b0   : > { %v1251_v58 = vmul.f32 %v1220_v49, %v1183_v29 }
 0x7b1   : > { %v1224_v45 = vmul.f32 0.5, %v1223_v46  ;;  %v1202_v50 = vpop.xlane.xlu0 %1201 }
 0x7b2   : > { %v1206_v52 = vmul.f32 %v1202_v50, %v3023_v10  ;;  %v1256_v62 = vmul.f32 %v1255_v57, %v1251_v58 }
 0x7b3   : > { %v1225_v53 = vsub.f32 1.5, %v1224_v45 }
 0x7b4   : > { %v2529_v54 = vpop.eup %2528  ;;  %v1210_v22 = vadd.f32 1e-05, %v1206_v52  ;;  %v3102_v3 = vadd.f32 %v1260_v61, %v1256_v62 }
 0x7b5   : > { %v1226_v24 = vmul.f32 %v2527_v37, %v1225_v53  ;;  %v1232_v47 = vmul.f32 %v2529_v54, %v1209_v40  ;;  %vm1238_vm4 = vweird.f32 %v2529_v54 }
 0x7b6   : > { %2530 = vrsqrt.f32 %v1210_v22  ;;  %vm1239_vm7 = vmor %vm1237_vm6, %vm1238_vm4  ;;  %vm1247_vm9 = vweird.f32 %v1210_v22 }
 0x7b7   : > { %v1230_v59 = vsel %vm1229_vm3, %v2527_v37, %v1226_v24  ;;  %v1233_v60 = vmul.f32 %v2529_v54, %v1232_v47 }
 0x7b8   : > { %v1252_v0 = vmul.f32 %v1230_v59, %v3071_v7 }
 0x7b9   : > { %v1234_v43 = vmul.f32 0.5, %v1233_v60 }
 0x7ba   : > { %v1257_v1 = vmul.f32 %v1255_v57, %v1252_v0 }
 0x7bb   : > { %v1235_v2 = vsub.f32 1.5, %v1234_v43 }
 0x7bc   : > { %v2531_v51 = vpop.eup %2530  ;;  %v3104_v4 = vadd.f32 %v1260_v61, %v1257_v1 }
 0x7bd   : > { %v1236_v29 = vmul.f32 %v2529_v54, %v1235_v2  ;;  %v1242_v5 = vmul.f32 %v2531_v51, %v1210_v22  ;;  %vm1248_vm8 = vweird.f32 %v2531_v51 }
 0x7be   : > { %v1283_v30 = vpack.c.bf16 %v3104_v4, %v3102_v3  ;;  %vm1249_vm10 = vmor %vm1247_vm9, %vm1248_vm8 }
 0x7bf   : > { %v1243_v6 = vmul.f32 %v2531_v51, %v1242_v5  ;;  %v1240_v7 = vsel %vm1239_vm7, %v2529_v54, %v1236_v29 }
 0x7c0   : > { %2331 = vmatmul.msk.bf16.vlgmr.msrb.gmra.mxu0 %vm472_vm5, %v1283_v30  ;;  %2337 = vmatmul.msk.bf16.vlgmr.msrb.gmra.mxu1 %vm472_vm5, %v1283_v30  ;;  %v1253_v38 = vmul.f32 %v1240_v7, %v3077_v12 }
 0x7c1   : > { %v1244_v8 = vmul.f32 0.5, %v1243_v6  ;;  %2343 = vmatmul.msk.bf16.vlgmr.msrb.gmra.mxu2 %vm472_vm5, %v1283_v30 }
 0x7c2   : > { %v1258_v34 = vmul.f32 %v1255_v57, %v1253_v38 }
 0x7c3   : > { %v1245_v9 = vsub.f32 1.5, %v1244_v8 }
 0x7c4   : > { %v3113_v16 = vadd.f32 %v1260_v61, %v1258_v34 }
 0x7c5   : > { %v1246_v11 = vmul.f32 %v2531_v51, %v1245_v9 }
 0x7c7   : > { %v1250_v13 = vsel %vm1249_vm10, %v2531_v51, %v1246_v11 }
 0x7c8   : > { %v1254_v39 = vmul.f32 %v1250_v13, %v3083_v63 }
 0x7ca   : > { %v1259_v14 = vmul.f32 %v1255_v57, %v1254_v39  ;;  %v2580_v39 = vld [vmem:[%s3385_s2] sm:$0xff] }
 0x7cc   : > { %v3115_v15 = vadd.f32 %v1260_v61, %v1259_v14 }
 0x7ce   : > { %v1284_v18 = vpack.c.bf16 %v3115_v15, %v3113_v16 }
 0x7d0   : > { %2332 = vmatmul.msk.bf16.gmra.mxu0 %vm472_vm5, %v1284_v18  ;;  %2338 = vmatmul.msk.bf16.gmra.mxu1 %vm472_vm5, %v1284_v18 }
 0x7d1   : > { %2344 = vmatmul.msk.bf16.gmra.mxu2 %vm472_vm5, %v1284_v18 }
 0x83d   : > { %v1333_v12 = vpop.f32.mrf.mxu1  ;;  %v1307_v31 = vpop.f32.mrf.mxu0 }
 0x83e   : > { %v1308_v37 = vadd.f32 %v1307_v31, %v1285_v27  ;;  %v1334_v54 = vadd.f32 %v1333_v12, %v1317_v26 }
 0x840   : > { %v1369_v52 = vmul.f32 %v2864_v55, %v1308_v37  ;;  %v1530_v53 = vmul.f32 %v2867_v56, %v1308_v37 }
 0x842   : > { %v1373_v47 = vmul.f32 0.35355338, %v1369_v52  ;;  %v1534_v59 = vmul.f32 0.35355338, %v1530_v53 }
 0x844   : > { %v1359_v19 = vpop.f32.mrf.mxu2 }
 0x845   : > { %v1335_v23 = vpop.f32.mrf.mxu1  ;;  %v1309_v42 = vpop.f32.mrf.mxu0  ;;  %v1360_v49 = vadd.f32 %v1359_v19, %v1343_v28  ;;  %v2581_v19 = vld [vmem:[%s3385_s2 + $0x8] sm:$0xff] }
 0x846   : > { %v1336_v40 = vadd.f32 %v1335_v23, %v1317_v26  ;;  %v1310_v60 = vadd.f32 %v1309_v42, %v1285_v27 }
 0x847   : > { %v1526_v22 = vmul.f32 %v2864_v55, %v1360_v49  ;;  %v1675_v24 = vmul.f32 %v2867_v56, %v1360_v49 }
 0x848   : > { %v1370_v62 = vmul.f32 %v2864_v55, %v1310_v60  ;;  %v1531_v0 = vmul.f32 %v2867_v56, %v1310_v60 }
 0x84a   : > { %v1374_v43 = vmul.f32 0.35355338, %v1370_v62  ;;  %v1535_v1 = vmul.f32 0.35355338, %v1531_v0 }
 0x84c   : > { %v1361_v25 = vpop.f32.mrf.mxu2 }
 0x84d   : > { %v1338_v63 = vpop.f32.mrf.mxu1  ;;  %v1362_v44 = vadd.f32 %v1361_v25, %v1343_v28  ;;  %v1312_v61 = vpop.f32.mrf.mxu0 }
 0x84e   : > { %v1339_v33 = vadd.f32 %v1338_v63, %v1317_v26  ;;  %v1313_v2 = vadd.f32 %v1312_v61, %v1285_v27 }
 0x84f   : > { %v1527_v57 = vmul.f32 %v2864_v55, %v1362_v44  ;;  %v1676_v58 = vmul.f32 %v2867_v56, %v1362_v44 }
 0x850   : > { %v1371_v51 = vmul.f32 %v2864_v55, %v1313_v2  ;;  %v1532_v29 = vmul.f32 %v2867_v56, %v1313_v2 }
 0x852   : > { %v1375_v30 = vmul.f32 0.35355338, %v1371_v51  ;;  %v1536_v6 = vmul.f32 0.35355338, %v1532_v29 }
 0x854   : > { %v1364_v17 = vpop.f32.mrf.mxu2 }
 0x855   : > { %v1340_v21 = vpop.f32.mrf.mxu1  ;;  %v1365_v35 = vadd.f32 %v1364_v17, %v1343_v28  ;;  %v1314_v5 = vpop.f32.mrf.mxu0 }
 0x856   : > { %v1341_v32 = vadd.f32 %v1340_v21, %v1317_v26  ;;  %v1315_v7 = vadd.f32 %v1314_v5, %v1285_v27  ;;  %v2582_v21 = vld [vmem:[%s3385_s2 + $0x10] sm:$0xff] }
 0x857   : > { %v1528_v45 = vmul.f32 %v2864_v55, %v1365_v35  ;;  %v1677_v50 = vmul.f32 %v2867_v56, %v1365_v35 }
 0x858   : > { %2345 = vmatpush.xpose.msk.msra.mxu3 %vm472_vm5, %v1341_v32  ;;  %2353 = vmatpush.xpose.msk.msra.mxu0 %vm472_vm5, %v1341_v32  ;;  %v1372_v8 = vmul.f32 %v2864_v55, %v1315_v7  ;;  %v1533_v9 = vmul.f32 %v2867_v56, %v1315_v7 }
 0x85a   : > { %v1376_v38 = vmul.f32 0.35355338, %v1372_v8  ;;  %v1537_v11 = vmul.f32 0.35355338, %v1533_v9 }
 0x85c   : > { %v1366_v41 = vpop.f32.mrf.mxu2  ;;  %2346 = vmatpush.xpose.msk.msra.mxu3 %vm472_vm5, %v1339_v33  ;;  %2354 = vmatpush.xpose.msk.msra.mxu0 %vm472_vm5, %v1339_v33 }
 0x85d   : > { %v1367_v36 = vadd.f32 %v1366_v41, %v1343_v28 }
 0x85f   : > { %v1529_v46 = vmul.f32 %v2864_v55, %v1367_v36  ;;  %v1678_v48 = vmul.f32 %v2867_v56, %v1367_v36  ;;  %v2583_v36 = vld [vmem:[%s3385_s2 + $0x18] sm:$0xff] }
 0x860   : > { %2347 = vmatpush.xpose.msk.msra.mxu3 %vm472_vm5, %v1336_v40  ;;  %2355 = vmatpush.xpose.msk.msra.mxu0 %vm472_vm5, %v1336_v40 }
 0x861   : > { %1703 = vmatpush.msra.mxu1 %v1678_v48  ;;  %1744 = vmatpush.msra.mxu2 %v1529_v46 }
 0x863   : > { %1704 = vmatpush.msra.mxu1 %v1677_v50  ;;  %1745 = vmatpush.msra.mxu2 %v1528_v45 }
 0x864   : > { %2348 = vmatpush.xpose.msk.msra.mxu3 %vm472_vm5, %v1334_v54  ;;  %2356 = vmatpush.xpose.msk.msra.mxu0 %vm472_vm5, %v1334_v54 }
 0x865   : > { %1705 = vmatpush.msra.mxu1 %v1676_v58  ;;  %1746 = vmatpush.msra.mxu2 %v1527_v57 }
 0x867   : > { %1706 = vmatpush.msra.mxu1 %v1675_v24  ;;  %1747 = vmatpush.msra.mxu2 %v1526_v22 }
 0x868   : > { %2349 = vmatmul.msk.f32.vlgmr.msra.gmra.mxu3 %vm472_vm5, %v1373_v47  ;;  %2357 = vmatmul.msk.f32.vlgmr.msra.gmra.mxu0 %vm472_vm5, %v1534_v59 }
 0x870   : > { %2350 = vmatmul.msk.f32.gmra.mxu3 %vm472_vm5, %v1374_v43  ;;  %2358 = vmatmul.msk.f32.gmra.mxu0 %vm472_vm5, %v1535_v1 }
 0x878   : > { %2351 = vmatmul.msk.f32.gmra.mxu3 %vm472_vm5, %v1375_v30  ;;  %2359 = vmatmul.msk.f32.gmra.mxu0 %vm472_vm5, %v1536_v6 }
 0x880   : > { %2352 = vmatmul.msk.f32.gmra.mxu3 %vm472_vm5, %v1376_v38  ;;  %2360 = vmatmul.msk.f32.gmra.mxu0 %vm472_vm5, %v1537_v11 }
 0x8e5   : > { %v1567_v13 = vpop.f32.mrf.mxu0 }
 0x8e6   : > { %v1568_v34 = vadd.f32 %v2580_v39, %v1567_v13 }
 0x8e8   : > { %v1579_v14 = vsel %vm405_vm2, %v1568_v34, -inf }
 0x8e9   : > { %1580 = vmax.xlane.f32.xlu2 %v1579_v14 }
 0x8eb   : > { %v1418_v18 = vpop.f32.mrf.mxu3 }
 0x8ec   : > { %v1419_v12 = vadd.f32 %v2580_v39, %v1418_v18 }
 0x8ed   : > { %v1570_v55 = vpop.f32.mrf.mxu0 }
 0x8ee   : > { %v1430_v56 = vsel %vm405_vm2, %v1419_v12, -inf  ;;  %v1571_v23 = vadd.f32 %v2581_v19, %v1570_v55 }
 0x8ef   : > { %1431 = vmax.xlane.f32.xlu1 %v1430_v56 }
 0x8f0   : > { %v1582_v31 = vsel %vm405_vm2, %v1571_v23, -inf }
 0x8f3   : > { %v1421_v25 = vpop.f32.mrf.mxu3 }
 0x8f4   : > { %v1422_v63 = vadd.f32 %v2581_v19, %v1421_v25 }
 0x8f5   : > { %v1573_v26 = vpop.f32.mrf.mxu0 }
 0x8f6   : > { %v1433_v17 = vsel %vm405_vm2, %v1422_v63, -inf  ;;  %v1574_v32 = vadd.f32 %v2582_v21, %v1573_v26 }
 0x8f7   : > { %1434 = vmax.xlane.f32.xlu0 %v1433_v17  ;;  %1583 = vmax.xlane.f32.xlu1 %v1582_v31 }
 0x8f8   : > { %v1585_v28 = vsel %vm405_vm2, %v1574_v32, -inf }
 0x8fb   : > { %v1424_v27 = vpop.f32.mrf.mxu3 }
 0x8fc   : > { %v1425_v33 = vadd.f32 %v2582_v21, %v1424_v27 }
 0x8fd   : > { %v1576_v35 = vpop.f32.mrf.mxu0 }
 0x8fe   : > { %v1436_v41 = vsel %vm405_vm2, %v1425_v33, -inf  ;;  %v1577_v37 = vadd.f32 %v2583_v36, %v1576_v35 }
 0x8ff   : > { %1586 = vmax.xlane.f32.xlu0 %v1585_v28  ;;  %1437 = vmax.xlane.f32.xlu2 %v1436_v41 }
 0x900   : > { %v1588_v46 = vsel %vm405_vm2, %v1577_v37, -inf }
 0x903   : > { %v1427_v40 = vpop.f32.mrf.mxu3 }
 0x904   : > { %v1428_v42 = vadd.f32 %v2583_v36, %v1427_v40 }
 0x906   : > { %v1439_v44 = vsel %vm405_vm2, %v1428_v42, -inf }
 0x907   : > { %1440 = vmax.xlane.f32.xlu1 %v1439_v44  ;;  %1589 = vmax.xlane.f32.xlu2 %v1588_v46 }
 0x95c   : > { %v1581_v48 = vpop.xlane.xlu2 %1580 }
 0x95d   : > { %v1591_v49 = vsub.f32 %v1568_v34, %v1581_v48 }
 0x95f   : > { %v1595_v45 = vmul.f32 1.442695, %v1591_v49 }
 0x961   : > { %2532 = vpow2.f32 %v1595_v45 }
 0x962   : > { %v1432_v50 = vpop.xlane.xlu1 %1431 }
 0x963   : > { %v1442_v52 = vsub.f32 %v1419_v12, %v1432_v50 }
 0x965   : > { %v1446_v53 = vmul.f32 1.442695, %v1442_v52 }
 0x967   : > { %v3179_v54 = vpop.eup %2532  ;;  %2534 = vpow2.f32 %v1446_v53 }
 0x968   : > { %v1603_v57 = vsel %vm405_vm2, %v3179_v54, 0.0 }
 0x969   : > { %1604 = vadd.xlane.f32.xlu1 %v1603_v57 }
 0x96a   : > { %v1435_v58 = vpop.xlane.xlu0 %1434  ;;  %v1584_v22 = vpop.xlane.xlu1 %1583 }
 0x96b   : > { %v1443_v24 = vsub.f32 %v1422_v63, %v1435_v58  ;;  %v1592_v47 = vsub.f32 %v1571_v23, %v1584_v22 }
 0x96d   : > { %v3183_v59 = vpop.eup %2534  ;;  %v1448_v60 = vmul.f32 1.442695, %v1443_v24  ;;  %v1597_v61 = vmul.f32 1.442695, %v1592_v47 }
 0x96e   : > { %v1454_v62 = vsel %vm405_vm2, %v3183_v59, 0.0 }
 0x96f   : > { %2536 = vpow2.f32 %v1448_v60  ;;  %1455 = vadd.xlane.f32.xlu0 %v1454_v62 }
 0x970   : > { %2538 = vpow2.f32 %v1597_v61 }
 0x972   : > { %v1587_v0 = vpop.xlane.xlu0 %1586  ;;  %v1438_v43 = vpop.xlane.xlu2 %1437 }
 0x973   : > { %v1593_v1 = vsub.f32 %v1574_v32, %v1587_v0  ;;  %v1444_v2 = vsub.f32 %v1425_v33, %v1438_v43 }
 0x975   : > { %v3187_v51 = vpop.eup %2536  ;;  %v1599_v29 = vmul.f32 1.442695, %v1593_v1  ;;  %v1450_v5 = vmul.f32 1.442695, %v1444_v2 }
 0x976   : > { %v3189_v30 = vpop.eup %2538  ;;  %v1457_v6 = vsel %vm405_vm2, %v3187_v51, 0.0 }
 0x977   : > { %2540 = vpow2.f32 %v1599_v29  ;;  %v1606_v7 = vsel %vm405_vm2, %v3189_v30, 0.0  ;;  %1458 = vadd.xlane.f32.xlu2 %v1457_v6 }
 0x978   : > { %2542 = vpow2.f32 %v1450_v5  ;;  %1607 = vadd.xlane.f32.xlu0 %v1606_v7 }
 0x97a   : > { %v1441_v8 = vpop.xlane.xlu1 %1440  ;;  %v1590_v9 = vpop.xlane.xlu2 %1589 }
 0x97b   : > { %v1445_v38 = vsub.f32 %v1428_v42, %v1441_v8  ;;  %v1594_v11 = vsub.f32 %v1577_v37, %v1590_v9 }
 0x97d   : > { %v3195_v13 = vpop.eup %2540  ;;  %v1452_v39 = vmul.f32 1.442695, %v1445_v38  ;;  %v1601_v34 = vmul.f32 1.442695, %v1594_v11 }
 0x97e   : > { %v3197_v14 = vpop.eup %2542  ;;  %v1609_v18 = vsel %vm405_vm2, %v3195_v13, 0.0 }
 0x97f   : > { %2544 = vpow2.f32 %v1452_v39  ;;  %1610 = vadd.xlane.f32.xlu2 %v1609_v18  ;;  %v1460_v12 = vsel %vm405_vm2, %v3197_v14, 0.0 }
 0x980   : > { %2546 = vpow2.f32 %v1601_v34  ;;  %1461 = vadd.xlane.f32.xlu1 %v1460_v12 }
 0x985   : > { %v3203_v55 = vpop.eup %2544 }
 0x986   : > { %v3205_v56 = vpop.eup %2546  ;;  %v1463_v19 = vsel %vm405_vm2, %v3203_v55, 0.0 }
 0x987   : > { %1464 = vadd.xlane.f32.xlu0 %v1463_v19  ;;  %v1612_v23 = vsel %vm405_vm2, %v3205_v56, 0.0 }
 0x988   : > { %1613 = vadd.xlane.f32.xlu1 %v1612_v23 }
 0x9dc   : > { %v1605_v25 = vpop.xlane.xlu1 %1604 }
 0x9dd   : > { %2548 = vrcp.f32 %v1605_v25  ;;  %v1626_v21 = vand.u32 2147483648, %v1605_v25  ;;  %v1624_v27 = vand.u32 2147483647, %v1605_v25  ;;  %vm1620_vm12 = vweird.f32 %v1605_v25 }
 0x9df   : > { %v1627_v36 = vor.u32 1.1754944e-38, %v1626_v21  ;;  %vm1625_vm14 = vcmp.eq.f32.partialorder %v1624_v27, 8.507059e+37 }
 0x9e2   : > { %v1456_v63 = vpop.xlane.xlu0 %1455 }
 0x9e3   : > { %v2549_v26 = vpop.eup %2548  ;;  %2550 = vrcp.f32 %v1456_v63  ;;  %v1477_v46 = vand.u32 2147483648, %v1456_v63  ;;  %v1475_v49 = vand.u32 2147483647, %v1456_v63  ;;  %vm1471_vm0 = vweird.f32 %v1456_v63 }
 0x9e4   : > { %v1616_v17 = vmul.f32 %v2549_v26, %v1605_v25  ;;  %vm1621_vm11 = vweird.f32 %v2549_v26 }
 0x9e5   : > { %vm1622_vm13 = vmor %vm1620_vm12, %vm1621_vm11  ;;  %v1478_v53 = vor.u32 1.1754944e-38, %v1477_v46  ;;  %vm1476_vm3 = vcmp.eq.f32.partialorder %v1475_v49, 8.507059e+37 }
 0x9e6   : > { %v1617_v31 = vsub.f32 1.0, %v1616_v17 }
 0x9e8   : > { %v1618_v32 = vmul.f32 %v2549_v26, %v1617_v31 }
 0x9e9   : > { %v2551_v33 = vpop.eup %2550 }
 0x9ea   : > { %v1619_v28 = vadd.f32 %v2549_v26, %v1618_v32  ;;  %v1467_v41 = vmul.f32 %v2551_v33, %v1456_v63  ;;  %v1459_v35 = vpop.xlane.xlu2 %1458  ;;  %vm1472_vm15 = vweird.f32 %v2551_v33 }
 0x9eb   : > { %v1608_v37 = vpop.xlane.xlu0 %1607  ;;  %2552 = vrcp.f32 %v1459_v35  ;;  %vm1473_vm1 = vmor %vm1471_vm0, %vm1472_vm15  ;;  %v1492_v1 = vand.u32 2147483648, %v1459_v35  ;;  %v1490_v2 = vand.u32 2147483647, %v1459_v35  ;;  %vm1486_vm6 = vweird.f32 %v1459_v35 }
 0x9ec   : > { %v1623_v40 = vsel %vm1622_vm13, %v2549_v26, %v1619_v28  ;;  %v1468_v42 = vsub.f32 1.0, %v1467_v41  ;;  %2554 = vrcp.f32 %v1608_v37  ;;  %v1641_v5 = vand.u32 2147483648, %v1608_v37 }
 0x9ed   : > { %v1628_v44 = vsel %vm1625_vm14, %v1627_v36, %v1623_v40  ;;  %v1639_v6 = vand.u32 2147483647, %v1608_v37  ;;  %vm1635_vm7 = vweird.f32 %v1608_v37  ;;  %v1493_v11 = vor.u32 1.1754944e-38, %v1492_v1 }
 0x9ee   : > { %v1469_v48 = vmul.f32 %v2551_v33, %v1468_v42  ;;  %v1629_v45 = vmul.f32 %v3179_v54, %v1628_v44  ;;  %vm1491_vm10 = vcmp.eq.f32.partialorder %v1490_v2, 8.507059e+37  ;;  %v1642_v12 = vor.u32 1.1754944e-38, %v1641_v5 }
 0x9ef   : > { %vm1640_vm11 = vcmp.eq.f32.partialorder %v1639_v6, 8.507059e+37 }
 0x9f0   : > { %v1470_v50 = vadd.f32 %v2551_v33, %v1469_v48  ;;  %2361 = vmatmul.msk.f32.vlgmr.msra.gmra.mxu1 %vm405_vm2, %v1629_v45 }
 0x9f1   : > { %v2553_v52 = vpop.eup %2552 }
 0x9f2   : > { %v2555_v57 = vpop.eup %2554  ;;  %v1474_v58 = vsel %vm1473_vm1, %v2551_v33, %v1470_v50  ;;  %v1482_v22 = vmul.f32 %v2553_v52, %v1459_v35  ;;  %v3213_v24 = vpop.xlane.xlu2 %1610  ;;  %vm1487_vm4 = vweird.f32 %v2553_v52 }
 0x9f3   : > { %v1479_v47 = vsel %vm1476_vm3, %v1478_v53, %v1474_v58  ;;  %v1631_v60 = vmul.f32 %v2555_v57, %v1608_v37  ;;  %v3215_v61 = vpop.xlane.xlu1 %1461  ;;  %2556 = vrcp.f32 %v3213_v24  ;;  %vm1636_vm8 = vweird.f32 %v2555_v57  ;;  %vm3221_vm9 = vmor %vm1486_vm6, %vm1487_vm4 }
 0x9f4   : > { %v1483_v54 = vsub.f32 1.0, %v1482_v22  ;;  %2558 = vrcp.f32 %v3215_v61  ;;  %v1480_v0 = vmul.f32 %v3183_v59, %v1479_v47  ;;  %v1507_v25 = vand.u32 2147483648, %v3215_v61  ;;  %vm1637_vm12 = vmor %vm1635_vm7, %vm1636_vm8 }
 0x9f5   : > { %v1632_v62 = vsub.f32 1.0, %v1631_v60  ;;  %v1656_v26 = vand.u32 2147483648, %v3213_v24  ;;  %v1654_v32 = vand.u32 2147483647, %v3213_v24  ;;  %v1505_v36 = vand.u32 2147483647, %v3215_v61 }
 0x9f6   : > { %v1484_v43 = vmul.f32 %v2553_v52, %v1483_v54  ;;  %2365 = vmatmul.msk.f32.vlgmr.msra.gmra.mxu2 %vm405_vm2, %v1480_v0  ;;  %vm1650_vm15 = vweird.f32 %v3213_v24  ;;  %vm1501_vm0 = vweird.f32 %v3215_v61  ;;  %v1508_v46 = vor.u32 1.1754944e-38, %v1507_v25 }
 0x9f7   : > { %v1633_v29 = vmul.f32 %v2555_v57, %v1632_v62  ;;  %v1657_v42 = vor.u32 1.1754944e-38, %v1656_v26  ;;  %vm1655_vm3 = vcmp.eq.f32.partialorder %v1654_v32, 8.507059e+37  ;;  %vm1506_vm6 = vcmp.eq.f32.partialorder %v1505_v36, 8.507059e+37 }
 0x9f8   : > { %v1485_v7 = vadd.f32 %v2553_v52, %v1484_v43  ;;  %v1763_v26 = vperm.slane %v3122_v20, 3 }
 0x9f9   : > { %v2557_v8 = vpop.eup %2556  ;;  %v1634_v9 = vadd.f32 %v2555_v57, %v1633_v29 }
 0x9fa   : > { %v2559_v59 = vpop.eup %2558  ;;  %v1646_v39 = vmul.f32 %v2557_v8, %v3213_v24  ;;  %v3226_v34 = vpop.xlane.xlu0 %1464  ;;  %v1489_v18 = vsel %vm3221_vm9, %v2553_v52, %v1485_v7  ;;  %vm1651_vm13 = vweird.f32 %v2557_v8 }
 0x9fb   : > { %v1497_v19 = vmul.f32 %v2559_v59, %v3215_v61  ;;  %2560 = vrcp.f32 %v3226_v34  ;;  %v3232_v23 = vpop.xlane.xlu1 %1613  ;;  %v1638_v31 = vsel %vm1637_vm12, %v2555_v57, %v1634_v9  ;;  %v1494_v21 = vsel %vm1491_vm10, %v1493_v11, %v1489_v18  ;;  %vm1652_vm1 = vmor %vm1650_vm15, %vm1651_vm13 }
 0x9fc   : > { %v1647_v63 = vsub.f32 1.0, %v1646_v39  ;;  %2562 = vrcp.f32 %v3232_v23  ;;  %v1643_v33 = vsel %vm1640_vm11, %v1642_v12, %v1638_v31  ;;  %v1495_v28 = vmul.f32 %v3187_v51, %v1494_v21 }
 0x9fd   : > { %v1498_v17 = vsub.f32 1.0, %v1497_v19  ;;  %v1644_v35 = vmul.f32 %v3189_v30, %v1643_v33  ;;  %vm1502_vm14 = vweird.f32 %v2559_v59  ;;  %v1522_v57 = vand.u32 2147483648, %v3226_v34 }
 0x9fe   : > { %v1648_v27 = vmul.f32 %v2557_v8, %v1647_v63  ;;  %2366 = vmatmul.msk.f32.gmra.mxu2 %vm405_vm2, %v1495_v28  ;;  %vm1503_vm4 = vmor %vm1501_vm0, %vm1502_vm14  ;;  %v1671_v60 = vand.u32 2147483648, %v3232_v23  ;;  %v1520_v61 = vand.u32 2147483647, %v3226_v34  ;;  %v1669_v62 = vand.u32 2147483647, %v3232_v23 }
 0x9ff   : > { %v1499_v41 = vmul.f32 %v2559_v59, %v1498_v17  ;;  %2362 = vmatmul.msk.f32.gmra.mxu1 %vm405_vm2, %v1644_v35  ;;  %vm1516_vm9 = vweird.f32 %v3226_v34  ;;  %v1523_v43 = vor.u32 1.1754944e-38, %v1522_v57  ;;  %vm1665_vm10 = vweird.f32 %v3232_v23 }
 0xa00   : > { %v1649_v37 = vadd.f32 %v2557_v8, %v1648_v27  ;;  %vm1521_vm13 = vcmp.eq.f32.partialorder %v1520_v61, 8.507059e+37  ;;  %vm1670_vm14 = vcmp.eq.f32.partialorder %v1669_v62, 8.507059e+37 }
 0xa01   : > { %v2561_v40 = vpop.eup %2560  ;;  %v1500_v51 = vadd.f32 %v2559_v59, %v1499_v41 }
 0xa02   : > { %v2563_v44 = vpop.eup %2562  ;;  %v1512_v30 = vmul.f32 %v2561_v40, %v3226_v34  ;;  %v1653_v48 = vsel %vm1652_vm1, %v2557_v8, %v1649_v37  ;;  %vm1517_vm7 = vweird.f32 %v2561_v40  ;;  %v2414_v8 = vld [vmem:[%s3387_s4 + $0x50] sm:$0xff] }
 0xa03   : > { %v1661_v49 = vmul.f32 %v2563_v44, %v3232_v23  ;;  %v1658_v45 = vsel %vm1655_vm3, %v1657_v42, %v1653_v48  ;;  %v1504_v50 = vsel %vm1503_vm4, %v2559_v59, %v1500_v51  ;;  %vm1666_vm8 = vweird.f32 %v2563_v44  ;;  %vm1518_vm11 = vmor %vm1516_vm9, %vm1517_vm7  ;;  %1783 = vmatpush.bf16.msrb.mxu3 %v2414_v8 }
 0xa04   : > { %v1513_v52 = vsub.f32 1.0, %v1512_v30  ;;  %v1509_v53 = vsel %vm1506_vm6, %v1508_v46, %v1504_v50  ;;  %v1659_v22 = vmul.f32 %v3195_v13, %v1658_v45  ;;  %vm1667_vm12 = vmor %vm1665_vm10, %vm1666_vm8 }
 0xa05   : > { %v1662_v58 = vsub.f32 1.0, %v1661_v49  ;;  %v1510_v24 = vmul.f32 %v3197_v14, %v1509_v53  ;;  %v1672_v14 = vor.u32 1.1754944e-38, %v1671_v60 }
 0xa06   : > { %v1514_v47 = vmul.f32 %v2561_v40, %v1513_v52 }
 0xa07   : > { %v1663_v54 = vmul.f32 %v2563_v44, %v1662_v58  ;;  %2367 = vmatmul.msk.f32.gmra.mxu2 %vm405_vm2, %v1510_v24  ;;  %2363 = vmatmul.msk.f32.gmra.mxu1 %vm405_vm2, %v1659_v22 }
 0xa08   : > { %v1515_v0 = vadd.f32 %v2561_v40, %v1514_v47 }
 0xa09   : > { %v1664_v13 = vadd.f32 %v2563_v44, %v1663_v54 }
 0xa0a   : > { %v1519_v1 = vsel %vm1518_vm11, %v2561_v40, %v1515_v0 }
 0xa0b   : > { %v1668_v2 = vsel %vm1667_vm12, %v2563_v44, %v1664_v13  ;;  %v1524_v29 = vsel %vm1521_vm13, %v1523_v43, %v1519_v1 }
 0xa0c   : > { %v1673_v5 = vsel %vm1670_vm14, %v1672_v14, %v1668_v2  ;;  %v1525_v6 = vmul.f32 %v3203_v55, %v1524_v29  ;;  %v2415_v14 = vld [vmem:[%s3387_s4 + $0x58] sm:$0xff] }
 0xa0d   : > { %v1674_v7 = vmul.f32 %v3205_v56, %v1673_v5  ;;  %1919 = vmatpush.bf16.msrb.mxu0 %v2415_v14 }
 0xa0f   : > { %2368 = vmatmul.msk.f32.gmra.mxu2 %vm405_vm2, %v1525_v6  ;;  %2364 = vmatmul.msk.f32.gmra.mxu1 %vm405_vm2, %v1674_v7 }
 0xa6d   : > { %v1708_v9 = vpop.f32.mrf.mxu1 }
 0xa79   : > { %v1749_v38 = vpop.f32.mrf.mxu2 }
 0xa7a   : > { %v1750_v39 = vadd.f32 %v1749_v38, %v1708_v9 }
 0xa7c   : > { %v1711_v59 = vpop.f32.mrf.mxu1 }
 0xa81   : > { %v1752_v11 = vpop.f32.mrf.mxu2 }
 0xa82   : > { %v1753_v34 = vadd.f32 %v1752_v11, %v1711_v59 }
 0xa84   : > { %v1761_v18 = vpack.c.bf16 %v1753_v34, %v1750_v39  ;;  %v1714_v55 = vpop.f32.mrf.mxu1 }
 0xa86   : > { %2373 = vmatmul.msk.bf16.vlgmr.msrb.gmra.mxu3 %vm472_vm5, %v1761_v18 }
 0xa8a   : > { %v1755_v56 = vpop.f32.mrf.mxu2 }
 0xa8b   : > { %v1756_v23 = vadd.f32 %v1755_v56, %v1714_v55 }
 0xa8c   : > { %v1717_v12 = vpop.f32.mrf.mxu1 }
 0xa92   : > { %v1758_v19 = vpop.f32.mrf.mxu2 }
 0xa93   : > { %v1759_v25 = vadd.f32 %v1758_v19, %v1717_v12 }
 0xa95   : > { %v1762_v63 = vpack.c.bf16 %v1759_v25, %v1756_v23 }
 0xa97   : > { %2374 = vmatmul.msk.bf16.gmra.mxu3 %vm472_vm5, %v1762_v63 }
 0xb09   : > { %v1785_v17 = vpop.f32.mrf.mxu3 }
 0xb0a   : > { %v1786_v31 = vadd.f32 %v1785_v17, %v1763_v26 }
 0xb0c   : > { %v1795_v21 = vadd.f32 %v1786_v31, %v3102_v3 }
 0xb0e   : > { %v1799_v32 = vsel %vm472_vm5, %v1795_v21, 0.0 }
 0xb0f   : > { %1800 = vadd.xlane.f32.xlu2 %v1799_v32 }
 0xb11   : > { %v1787_v27 = vpop.f32.mrf.mxu3 }
 0xb12   : > { %v1788_v33 = vadd.f32 %v1787_v27, %v1763_v26 }
 0xb14   : > { %v1796_v28 = vadd.f32 %v1788_v33, %v3104_v4 }
 0xb16   : > { %v1802_v41 = vsel %vm472_vm5, %v1796_v28, 0.0 }
 0xb17   : > { %1803 = vadd.xlane.f32.xlu0 %v1802_v41 }
 0xb1a   : > { %v1790_v35 = vpop.f32.mrf.mxu3 }
 0xb1b   : > { %v1791_v36 = vadd.f32 %v1790_v35, %v1763_v26 }
 0xb1d   : > { %v1797_v37 = vadd.f32 %v1791_v36, %v3113_v16 }
 0xb1f   : > { %v1805_v40 = vsel %vm472_vm5, %v1797_v37, 0.0 }
 0xb20   : > { %1806 = vadd.xlane.f32.xlu1 %v1805_v40 }
 0xb22   : > { %v1792_v42 = vpop.f32.mrf.mxu3 }
 0xb23   : > { %v1793_v51 = vadd.f32 %v1792_v42, %v1763_v26  ;;  %v1887_v26 = vperm.slane %v3122_v20, 6 }
 0xb25   : > { %v1798_v3 = vadd.f32 %v1793_v51, %v3115_v15 }
 0xb27   : > { %v1808_v44 = vsel %vm472_vm5, %v1798_v3, 0.0 }
 0xb28   : > { %1809 = vadd.xlane.f32.xlu2 %v1808_v44 }
 0xb82   : > { %v1801_v46 = vpop.xlane.xlu2 %1800 }
 0xb83   : > { %v1811_v4 = vmul.f32 %v1801_v46, %v3023_v10 }
 0xb85   : > { %v1815_v30 = vsub.f32 %v1795_v21, %v1811_v4 }
 0xb87   : > { %v1819_v48 = vmul.f32 %v1815_v30, %v1815_v30 }
 0xb89   : > { %v1823_v49 = vsel %vm472_vm5, %v1819_v48, 0.0 }
 0xb8a   : > { %v1804_v45 = vpop.xlane.xlu0 %1803  ;;  %1824 = vadd.xlane.f32.xlu0 %v1823_v49 }
 0xb8b   : > { %v1812_v16 = vmul.f32 %v1804_v45, %v3023_v10 }
 0xb8d   : > { %v1816_v50 = vsub.f32 %v1796_v28, %v1812_v16  ;;  %v1892_v28 = vperm.slane %v3122_v20, 7 }
 0xb8f   : > { %v1820_v52 = vmul.f32 %v1816_v50, %v1816_v50 }
 0xb91   : > { %v1826_v53 = vsel %vm472_vm5, %v1820_v52, 0.0 }
 0xb92   : > { %1827 = vadd.xlane.f32.xlu1 %v1826_v53 }
 0xb93   : > { %v1807_v15 = vpop.xlane.xlu1 %1806 }
 0xb94   : > { %v1813_v57 = vmul.f32 %v1807_v15, %v3023_v10 }
 0xb96   : > { %v3283_v58 = vsub.f32 %v1797_v37, %v1813_v57 }
 0xb98   : > { %v1821_v22 = vmul.f32 %v3283_v58, %v3283_v58 }
 0xb9a   : > { %v1829_v24 = vsel %vm472_vm5, %v1821_v22, 0.0 }
 0xb9b   : > { %1830 = vadd.xlane.f32.xlu2 %v1829_v24  ;;  %v1810_v47 = vpop.xlane.xlu2 %1809 }
 0xb9c   : > { %v1814_v60 = vmul.f32 %v1810_v47, %v3023_v10 }
 0xb9e   : > { %v3289_v61 = vsub.f32 %v1798_v3, %v1814_v60  ;;  %v2417_v60 = vld [vmem:[%s3387_s4 + $0x68] sm:$0xff] }
 0xb9f   : > { %1962 = vmatpush.bf16.msrb.mxu1 %v2417_v60 }
 0xba0   : > { %v1822_v54 = vmul.f32 %v3289_v61, %v3289_v61 }
 0xba2   : > { %v1832_v62 = vsel %vm472_vm5, %v1822_v54, 0.0 }
 0xba3   : > { %1833 = vadd.xlane.f32.xlu0 %v1832_v62 }
 0xbfd   : > { %v1825_v0 = vpop.xlane.xlu0 %1824 }
 0xbfe   : > { %v1835_v43 = vmul.f32 %v1825_v0, %v3023_v10 }
 0xc00   : > { %v1839_v13 = vadd.f32 1e-05, %v1835_v43 }
 0xc02   : > { %2564 = vrsqrt.f32 %v1839_v13  ;;  %vm1849_vm0 = vweird.f32 %v1839_v13 }
 0xc05   : > { %v1828_v1 = vpop.xlane.xlu1 %1827 }
 0xc06   : > { %v1836_v2 = vmul.f32 %v1828_v1, %v3023_v10 }
 0xc08   : > { %v2565_v29 = vpop.eup %2564  ;;  %v1840_v5 = vadd.f32 1e-05, %v1836_v2 }
 0xc09   : > { %v1844_v6 = vmul.f32 %v2565_v29, %v1839_v13  ;;  %vm1850_vm15 = vweird.f32 %v2565_v29 }
 0xc0a   : > { %2566 = vrsqrt.f32 %v1840_v5  ;;  %vm1851_vm1 = vmor %vm1849_vm0, %vm1850_vm15  ;;  %vm1859_vm4 = vweird.f32 %v1840_v5 }
 0xc0b   : > { %v1845_v7 = vmul.f32 %v2565_v29, %v1844_v6 }
 0xc0d   : > { %v1846_v8 = vmul.f32 0.5, %v1845_v7 }
 0xc0e   : > { %v1831_v9 = vpop.xlane.xlu2 %1830 }
 0xc0f   : > { %v1837_v38 = vmul.f32 %v1831_v9, %v3023_v10  ;;  %v1847_v59 = vsub.f32 1.5, %v1846_v8 }
 0xc10   : > { %v2567_v11 = vpop.eup %2566 }
 0xc11   : > { %v1841_v39 = vadd.f32 1e-05, %v1837_v38  ;;  %v1848_v34 = vmul.f32 %v2565_v29, %v1847_v59  ;;  %v1854_v18 = vmul.f32 %v2567_v11, %v1840_v5  ;;  %vm1860_vm3 = vweird.f32 %v2567_v11 }
 0xc12   : > { %vm1861_vm6 = vmor %vm1859_vm4, %vm1860_vm3  ;;  %v1937_v38 = vperm.slane %v3122_v20, 5 }
 0xc13   : > { %2568 = vrsqrt.f32 %v1841_v39  ;;  %v1855_v55 = vmul.f32 %v2567_v11, %v1854_v18  ;;  %v1852_v56 = vsel %vm1851_vm1, %v2565_v29, %v1848_v34  ;;  %vm1869_vm8 = vweird.f32 %v1841_v39 }
 0xc14   : > { %v1883_v17 = vmul.f32 %v1852_v56, %v1815_v30 }
 0xc15   : > { %v1856_v12 = vmul.f32 0.5, %v1855_v55 }
 0xc16   : > { %v1834_v19 = vpop.xlane.xlu0 %1833  ;;  %v1888_v41 = vmul.f32 %v1887_v26, %v1883_v17 }
 0xc17   : > { %v1838_v23 = vmul.f32 %v1834_v19, %v3023_v10  ;;  %v1857_v25 = vsub.f32 1.5, %v1856_v12 }
 0xc18   : > { %v1893_v51 = vadd.f32 %v1892_v28, %v1888_v41 }
 0xc19   : > { %v2569_v63 = vpop.eup %2568  ;;  %v1842_v31 = vadd.f32 1e-05, %v1838_v23  ;;  %v1858_v21 = vmul.f32 %v2567_v11, %v1857_v25 }
 0xc1a   : > { %v1864_v32 = vmul.f32 %v2569_v63, %v1841_v39  ;;  %vm1870_vm7 = vweird.f32 %v2569_v63 }
 0xc1b   : > { %2570 = vrsqrt.f32 %v1842_v31  ;;  %v1862_v27 = vsel %vm1861_vm6, %v2567_v11, %v1858_v21  ;;  %vm1871_vm9 = vmor %vm1869_vm8, %vm1870_vm7  ;;  %vm1879_vm11 = vweird.f32 %v1842_v31 }
 0xc1c   : > { %v1865_v33 = vmul.f32 %v2569_v63, %v1864_v32  ;;  %v1884_v35 = vmul.f32 %v1862_v27, %v1816_v50 }
 0xc1e   : > { %v1866_v36 = vmul.f32 0.5, %v1865_v33  ;;  %v1889_v37 = vmul.f32 %v1887_v26, %v1884_v35 }
 0xc20   : > { %v1867_v40 = vsub.f32 1.5, %v1866_v36  ;;  %v1894_v3 = vadd.f32 %v1892_v28, %v1889_v37 }
 0xc21   : > { %v2571_v42 = vpop.eup %2570 }
 0xc22   : > { %v1868_v44 = vmul.f32 %v2569_v63, %v1867_v40  ;;  %v1874_v46 = vmul.f32 %v2571_v42, %v1842_v31  ;;  %v1897_v4 = vpack.c.bf16 %v1894_v3, %v1893_v51  ;;  %vm1880_vm10 = vweird.f32 %v2571_v42 }
 0xc23   : > { %vm1881_vm12 = vmor %vm1879_vm11, %vm1880_vm10 }
 0xc24   : > { %v1875_v30 = vmul.f32 %v2571_v42, %v1874_v46  ;;  %2379 = vmatmul.msk.bf16.vlgmr.msrb.gmra.mxu0 %vm472_vm5, %v1897_v4  ;;  %v1872_v48 = vsel %vm1871_vm9, %v2569_v63, %v1868_v44 }
 0xc25   : > { %v1885_v16 = vmul.f32 %v1872_v48, %v3283_v58  ;;  %v2416_v58 = vld [vmem:[%s3387_s4 + $0x60] sm:$0xff] }
 0xc26   : > { %v1876_v49 = vmul.f32 0.5, %v1875_v30  ;;  %1963 = vmatpush.bf16.msrb.mxu1 %v2416_v58 }
 0xc27   : > { %v1890_v15 = vmul.f32 %v1887_v26, %v1885_v16 }
 0xc28   : > { %v1877_v45 = vsub.f32 1.5, %v1876_v49 }
 0xc29   : > { %v1895_v22 = vadd.f32 %v1892_v28, %v1890_v15 }
 0xc2a   : > { %v1878_v50 = vmul.f32 %v2571_v42, %v1877_v45 }
 0xc2c   : > { %v1882_v52 = vsel %vm1881_vm12, %v2571_v42, %v1878_v50 }
 0xc2d   : > { %v1886_v53 = vmul.f32 %v1882_v52, %v3289_v61  ;;  %v1899_v61 = vperm.slane %v3122_v20, 4 }
 0xc2f   : > { %v1891_v57 = vmul.f32 %v1887_v26, %v1886_v53  ;;  %v2418_v53 = vld [vmem:[%s3389_s6] sm:$0xff] }
 0xc30   : > { %2104 = vmatpush.bf16.msrb.mxu2 %v2418_v53 }
 0xc31   : > { %v1896_v24 = vadd.f32 %v1892_v28, %v1891_v57 }
 0xc33   : > { %v1898_v47 = vpack.c.bf16 %v1896_v24, %v1895_v22 }
 0xc35   : > { %2380 = vmatmul.msk.bf16.gmra.mxu0 %vm472_vm5, %v1898_v47 }
 0xca1   : > { %v1921_v54 = vpop.f32.mrf.mxu0 }
 0xca2   : > { %v1922_v62 = vadd.f32 %v1921_v54, %v1899_v61 }
 0xca4   : > { %v1931_v13 = vmax.f32 %v1922_v62, 0.0 }
 0xca9   : > { %v1923_v0 = vpop.f32.mrf.mxu0 }
 0xcaa   : > { %v1924_v43 = vadd.f32 %v1923_v0, %v1899_v61 }
 0xcac   : > { %v1932_v14 = vmax.f32 %v1924_v43, 0.0 }
 0xcae   : > { %v1935_v1 = vpack.c.bf16 %v1932_v14, %v1931_v13 }
 0xcb0   : > { %2389 = vmatmul.msk.bf16.vlgmr.msrb.gmra.mxu1 %vm405_vm2, %v1935_v1 }
 0xcb2   : > { %v1926_v2 = vpop.f32.mrf.mxu0 }
 0xcb3   : > { %v1927_v29 = vadd.f32 %v1926_v2, %v1899_v61  ;;  %v1282_v2 = vld [vmem:[#allocation2 + $0x18] sm:$0xff] }
 0xcb5   : > { %v1933_v7 = vmax.f32 %v1927_v29, 0.0 }
 0xcba   : > { %v1928_v5 = vpop.f32.mrf.mxu0 }
 0xcbb   : > { %v1929_v6 = vadd.f32 %v1928_v5, %v1899_v61 }
 0xcbd   : > { %v1934_v8 = vmax.f32 %v1929_v6, 0.0 }
 0xcbf   : > { %v1936_v9 = vpack.c.bf16 %v1934_v8, %v1933_v7 }
 0xcc1   : > { %2390 = vmatmul.msk.bf16.gmra.mxu1 %vm405_vm2, %v1936_v9 }
 0xd2d   : > { %v1965_v59 = vpop.f32.mrf.mxu1 }
 0xd2e   : > { %v1966_v11 = vadd.f32 %v1965_v59, %v1937_v38 }
 0xd30   : > { %v1975_v39 = vadd.f32 %v1966_v11, %v1893_v51 }
 0xd32   : > { %v1979_v34 = vsel %vm472_vm5, %v1975_v39, 0.0 }
 0xd33   : > { %1980 = vadd.xlane.f32.xlu1 %v1979_v34 }
 0xd35   : > { %v1967_v18 = vpop.f32.mrf.mxu1 }
 0xd36   : > { %v1968_v55 = vadd.f32 %v1967_v18, %v1937_v38 }
 0xd38   : > { %v1976_v56 = vadd.f32 %v1968_v55, %v1894_v3 }
 0xd3a   : > { %v1982_v12 = vsel %vm472_vm5, %v1976_v56, 0.0 }
 0xd3b   : > { %1983 = vadd.xlane.f32.xlu2 %v1982_v12 }
 0xd3e   : > { %v1970_v19 = vpop.f32.mrf.mxu1 }
 0xd3f   : > { %v1971_v23 = vadd.f32 %v1970_v19, %v1937_v38 }
 0xd41   : > { %v1977_v25 = vadd.f32 %v1971_v23, %v1895_v22 }
 0xd43   : > { %v1985_v63 = vsel %vm472_vm5, %v1977_v25, 0.0 }
 0xd44   : > { %1986 = vadd.xlane.f32.xlu0 %v1985_v63 }
 0xd46   : > { %v1972_v26 = vpop.f32.mrf.mxu1 }
 0xd47   : > { %v1973_v20 = vadd.f32 %v1972_v26, %v1937_v38  ;;  %v2067_v38 = vperm.slane %v1282_v2, 0 }
 0xd49   : > { %v1978_v17 = vadd.f32 %v1973_v20, %v1896_v24 }
 0xd4b   : > { %v1988_v31 = vsel %vm472_vm5, %v1978_v17, 0.0 }
 0xd4c   : > { %1989 = vadd.xlane.f32.xlu1 %v1988_v31 }
 0xda6   : > { %v1981_v21 = vpop.xlane.xlu1 %1980 }
 0xda7   : > { %v1991_v32 = vmul.f32 %v1981_v21, %v3023_v10 }
 0xda9   : > { %v1995_v27 = vsub.f32 %v1975_v39, %v1991_v32 }
 0xdab   : > { %v1999_v33 = vmul.f32 %v1995_v27, %v1995_v27 }
 0xdad   : > { %v2003_v28 = vsel %vm472_vm5, %v1999_v33, 0.0 }
 0xdae   : > { %2004 = vadd.xlane.f32.xlu2 %v2003_v28  ;;  %v1984_v41 = vpop.xlane.xlu2 %1983 }
 0xdaf   : > { %v1992_v35 = vmul.f32 %v1984_v41, %v3023_v10 }
 0xdb1   : > { %v1996_v36 = vsub.f32 %v1976_v56, %v1992_v35  ;;  %v2072_v56 = vperm.slane %v1282_v2, 1 }
 0xdb3   : > { %v2000_v37 = vmul.f32 %v1996_v36, %v1996_v36 }
 0xdb5   : > { %v2006_v40 = vsel %vm472_vm5, %v2000_v37, 0.0 }
 0xdb6   : > { %2007 = vadd.xlane.f32.xlu0 %v2006_v40 }
 0xdb7   : > { %v1987_v42 = vpop.xlane.xlu0 %1986 }
 0xdb8   : > { %v1993_v51 = vmul.f32 %v1987_v42, %v3023_v10 }
 0xdba   : > { %v3326_v3 = vsub.f32 %v1977_v25, %v1993_v51 }
 0xdbc   : > { %v2001_v44 = vmul.f32 %v3326_v3, %v3326_v3 }
 0xdbe   : > { %v2009_v46 = vsel %vm472_vm5, %v2001_v44, 0.0 }
 0xdbf   : > { %v1990_v4 = vpop.xlane.xlu1 %1989  ;;  %2010 = vadd.xlane.f32.xlu1 %v2009_v46 }
 0xdc0   : > { %v1994_v30 = vmul.f32 %v1990_v4, %v3023_v10 }
 0xdc2   : > { %v3332_v48 = vsub.f32 %v1978_v17, %v1994_v30 }
 0xdc4   : > { %v2002_v49 = vmul.f32 %v3332_v48, %v3332_v48 }
 0xdc6   : > { %v2012_v45 = vsel %vm472_vm5, %v2002_v49, 0.0 }
 0xdc7   : > { %2013 = vadd.xlane.f32.xlu2 %v2012_v45 }
 0xe21   : > { %v2005_v16 = vpop.xlane.xlu2 %2004 }
 0xe22   : > { %v2015_v50 = vmul.f32 %v2005_v16, %v3023_v10 }
 0xe24   : > { %v2019_v52 = vadd.f32 1e-05, %v2015_v50 }
 0xe26   : > { %2572 = vrsqrt.f32 %v2019_v52  ;;  %vm2029_vm13 = vweird.f32 %v2019_v52 }
 0xe29   : > { %v2008_v15 = vpop.xlane.xlu0 %2007 }
 0xe2a   : > { %v2016_v57 = vmul.f32 %v2008_v15, %v3023_v10 }
 0xe2c   : > { %v2573_v22 = vpop.eup %2572  ;;  %v2020_v24 = vadd.f32 1e-05, %v2016_v57 }
 0xe2d   : > { %v2024_v47 = vmul.f32 %v2573_v22, %v2019_v52  ;;  %vm2030_vm2 = vweird.f32 %v2573_v22 }
 0xe2e   : > { %2574 = vrsqrt.f32 %v2020_v24  ;;  %vm2031_vm14 = vmor %vm2029_vm13, %vm2030_vm2  ;;  %vm2039_vm0 = vweird.f32 %v2020_v24 }
 0xe2f   : > { %v2025_v60 = vmul.f32 %v2573_v22, %v2024_v47 }
 0xe31   : > { %v2026_v58 = vmul.f32 0.5, %v2025_v60 }
 0xe32   : > { %v2011_v54 = vpop.xlane.xlu1 %2010 }
 0xe33   : > { %v2017_v61 = vmul.f32 %v2011_v54, %v3023_v10  ;;  %v2027_v62 = vsub.f32 1.5, %v2026_v58 }
 0xe34   : > { %v2575_v0 = vpop.eup %2574 }
 0xe35   : > { %v2021_v43 = vadd.f32 1e-05, %v2017_v61  ;;  %v2028_v13 = vmul.f32 %v2573_v22, %v2027_v62  ;;  %v2034_v14 = vmul.f32 %v2575_v0, %v2020_v24  ;;  %vm2040_vm15 = vweird.f32 %v2575_v0 }
 0xe36   : > { %vm2041_vm1 = vmor %vm2039_vm0, %vm2040_vm15 }
 0xe37   : > { %2576 = vrsqrt.f32 %v2021_v43  ;;  %v2035_v1 = vmul.f32 %v2575_v0, %v2034_v14  ;;  %v2032_v29 = vsel %vm2031_vm14, %v2573_v22, %v2028_v13  ;;  %vm2049_vm4 = vweird.f32 %v2021_v43 }
 0xe38   : > { %v2063_v59 = vmul.f32 %v2032_v29, %v1995_v27 }
 0xe39   : > { %v2036_v5 = vmul.f32 0.5, %v2035_v1 }
 0xe3a   : > { %v2014_v6 = vpop.xlane.xlu2 %2013  ;;  %v2068_v12 = vmul.f32 %v2067_v38, %v2063_v59 }
 0xe3b   : > { %v2018_v7 = vmul.f32 %v2014_v6, %v3023_v10  ;;  %v2037_v8 = vsub.f32 1.5, %v2036_v5 }
 0xe3c   : > { %v2073_v26 = vadd.f32 %v2072_v56, %v2068_v12 }
 0xe3d   : > { %v2577_v9 = vpop.eup %2576  ;;  %v2022_v11 = vadd.f32 1e-05, %v2018_v7  ;;  %v2038_v39 = vmul.f32 %v2575_v0, %v2037_v8 }
 0xe3e   : > { %v2044_v34 = vmul.f32 %v2577_v9, %v2021_v43  ;;  %vm2050_vm3 = vweird.f32 %v2577_v9 }
 0xe3f   : > { %2578 = vrsqrt.f32 %v2022_v11  ;;  %v2042_v18 = vsel %vm2041_vm1, %v2575_v0, %v2038_v39  ;;  %vm2051_vm6 = vmor %vm2049_vm4, %vm2050_vm3  ;;  %vm2059_vm8 = vweird.f32 %v2022_v11 }
 0xe40   : > { %v2045_v55 = vmul.f32 %v2577_v9, %v2044_v34  ;;  %v2064_v19 = vmul.f32 %v2042_v18, %v1996_v36 }
 0xe42   : > { %v2046_v23 = vmul.f32 0.5, %v2045_v55  ;;  %v2069_v25 = vmul.f32 %v2067_v38, %v2064_v19 }
 0xe44   : > { %v2047_v63 = vsub.f32 1.5, %v2046_v23  ;;  %v2074_v20 = vadd.f32 %v2072_v56, %v2069_v25 }
 0xe45   : > { %v2579_v10 = vpop.eup %2578 }
 0xe46   : > { %v2048_v17 = vmul.f32 %v2577_v9, %v2047_v63  ;;  %v2054_v31 = vmul.f32 %v2579_v10, %v2022_v11  ;;  %v2077_v21 = vpack.c.bf16 %v2074_v20, %v2073_v26  ;;  %vm2060_vm7 = vweird.f32 %v2579_v10 }
 0xe47   : > { %vm2061_vm9 = vmor %vm2059_vm8, %vm2060_vm7 }
 0xe48   : > { %v2055_v32 = vmul.f32 %v2579_v10, %v2054_v31  ;;  %2395 = vmatmul.msk.bf16.vlgmr.msrb.gmra.mxu2 %vm472_vm5, %v2077_v21  ;;  %v2052_v27 = vsel %vm2051_vm6, %v2577_v9, %v2048_v17 }
 0xe49   : > { %v2065_v41 = vmul.f32 %v2052_v27, %v3326_v3  ;;  %v2481_v3 = vld [vmem:[%s3390_s7] ss:$0 sm:$0xff] }
 0xe4a   : > { %v2056_v33 = vmul.f32 0.5, %v2055_v32 }
 0xe4b   : > { %v2070_v40 = vmul.f32 %v2067_v38, %v2065_v41 }
 0xe4c   : > { %v2057_v28 = vsub.f32 1.5, %v2056_v33 }
 0xe4d   : > { %v2075_v51 = vadd.f32 %v2072_v56, %v2070_v40 }
 0xe4e   : > { %v2058_v35 = vmul.f32 %v2579_v10, %v2057_v28 }
 0xe50   : > { %v2062_v36 = vsel %vm2061_vm9, %v2579_v10, %v2058_v35 }
 0xe51   : > { %v2066_v37 = vmul.f32 %v2062_v36, %v3332_v48 }
 0xe53   : > { %v2071_v42 = vmul.f32 %v2067_v38, %v2066_v37 }
 0xe55   : > { %v2076_v44 = vadd.f32 %v2072_v56, %v2071_v42 }
 0xe57   : > { %v2078_v46 = vpack.c.bf16 %v2076_v44, %v2075_v51 }
 0xe59   : > { %2396 = vmatmul.msk.bf16.gmra.mxu2 %vm472_vm5, %v2078_v46 }
 0xecb   : > { %v2106_v4 = vpop.f32.mrf.mxu2 }
 0xecc   : > { %v2107_v30 = vadd.f32 %v2481_v3, %v2106_v4 }
 0xece   : > { %2116 = vst [vmem:[%s332_s21] sm:$0xff] %v2107_v30 }
 0xed3   : > { %v2108_v49 = vpop.f32.mrf.mxu2 }
 0xed4   : > { %v2109_v48 = vadd.f32 %v2481_v3, %v2108_v49 }
 0xed6   : > { %2117 = vst [vmem:[%s332_s21 + $0x8] sm:$0xff] %v2109_v48 }
 0xedc   : > { %v2111_v45 = vpop.f32.mrf.mxu2 }
 0xedd   : > { %v2112_v16 = vadd.f32 %v2481_v3, %v2111_v45 }
 0xedf   : > { %2118 = vst [vmem:[%s332_s21 + $0x10] sm:$0xff] %v2112_v16 }
 0xee4   : > { %v2113_v50 = vpop.f32.mrf.mxu2 }
 0xee5   : > { %v2114_v52 = vadd.f32 %v2481_v3, %v2113_v50 }
 0xee7   : > { %2119 = vst [vmem:[%s332_s21 + $0x18] sm:$0xff] %v2114_v52 }
 0xee8   : > { %2641 = shalt.err (!%p2638_p8)
}
 0xee9   : > { %s2688_s25 = smov 128   ;;  %s2689_s21 = smov 8  }
 0xeea   : > { %2426 = dma.vmem_to_hbm [thread:$0]  (%p2773_p5), %s2134_s12, 512, %s2136_s13, %s2121_s17, %s2688_s25, %s2688_s25, %s2689_s21  }
 0xeeb PF: > { %p2438_p9 = scmp.ge.s32.totalorder %s2680_s30, 2  ;;  %s2150_s26 = sand.u32 1, %s2668_s27  }
 0xeec   : > { %s2151_s10 = scalar_lea.sflag [#allocation4], %s2150_s26 }
 0xeed   : > { %p2433_p10 = pnand %p2438_p9, %p2777_p6 }
 0xeef   : > { %p2434_p11 = pneg %p2433_p10 }
 0xef1   : > { %2663 = dma.done.wait (%p2434_p11), %s2151_s10, 512  }
 0xef2   : > { %2665 = vsyncadd (%p2434_p11), %s2151_s10, 4294966784  ;;  %p19_p12 = scmp.ge.s32.totalorder %s2760_s11, 4   ;;  %s3398_s27 = smov %s2672_s28 }
 0xef3   : > { %s3399_s28 = smov %s2676_s29  ;;  %s3400_s29 = smov %s2771_s14 }
 0xef4   : > { %s3401_s30 = smov %s2760_s11  ;;  %21 = sbr.rel (!%p19_p12) target bundleno = 4 (0x4), region = 97 }
 0xef9   :  { %2157 = vsyncpa [#allocation3], 1 }
 0xefa   :  { %2159 = vsyncpa [#allocation3 + $0x1], 1 }
 0xefb   :  { %2160 = vsyncpa [#allocation4], 1 }
 0xefc   :  { %2162 = vsyncpa [#allocation4 + $0x1], 1 }

</bundles_post_ra>
